<compile_context>
chip_gen: v7x
topology: tpu7x:2x2x1
jax: 0.10.0
libtpu: 0.0.40
codegen_flags: <defaults>
</compile_context>

<pallas_src>
import jax
import jax.numpy as jnp
from jax.experimental import pallas as pl
from jax.experimental.pallas import tpu as pltpu

_EPS = 1e-5


# ---------------------------------------------------------------------------
# Fused kernel: embedding Linear + L x (GraphConv -> BatchNorm -> ReLU)
# ---------------------------------------------------------------------------
def _encoder_kernel(x_ref, adj_ref, emb_w_ref, emb_b_ref, wcat_ref, gb_ref,
                    o_ref):
    n_nodes = x_ref.shape[0]
    hdim = emb_w_ref.shape[1]
    num_layers = wcat_ref.shape[0]
    inv_n = 1.0 / n_nodes

    # Dense adjacency, loaded once (bf16: 0/1 entries are exact).
    adj = adj_ref[...]

    # ---- embedding Linear: bf16 MXU pass, f32 accumulate -------------------
    h = jnp.dot(x_ref[...].astype(jnp.bfloat16), emb_w_ref[...],
                preferred_element_type=jnp.float32) + emb_b_ref[...]

    # ---- L x (GraphConv -> BN -> ReLU); static trip count => fully unrolled,
    #      activation never touches HBM between layers.
    for l in range(num_layers):
        w_cat = wcat_ref[l]                       # [H, 2H] bf16 (Wself|Wneigh)
        gb = gb_ref[l]                            # [2, H]  f32  (gamma, beta)
        gamma = gb[0:1, :]
        beta = gb[1:2, :]

        # GraphConv:  h_c = X @ Wself + A @ (X @ Wneigh)
        # (conv bias omitted -- exactly cancelled by the batch-stat BN below)
        xw = jnp.dot(h.astype(jnp.bfloat16), w_cat,
                     preferred_element_type=jnp.float32)           # [N, 2H]
        x_self = xw[:, :hdim]
        x_neigh = xw[:, hdim:]
        agg = jnp.dot(adj, x_neigh.astype(jnp.bfloat16),
                      preferred_element_type=jnp.float32)          # [N, H]
        hc = x_self + agg

        # BatchNorm (training-mode batch stats): one fused reduction over the
        # concatenated [N, 2H] tensor (h || h*h) gives sum and sum-of-squares.
        st = jnp.sum(jnp.concatenate([hc, hc * hc], axis=1),
                     axis=0, keepdims=True)                        # [1, 2H]
        mean = st[:, :hdim] * inv_n
        var = jnp.maximum(st[:, hdim:] * inv_n - mean * mean, 0.0)
        a = gamma * jax.lax.rsqrt(var + _EPS)                      # [1, H]
        c = beta - mean * a                                        # [1, H]

        # BN affine + ReLU: 2 VPU ops per element on the [N, H] tile.
        h = jnp.maximum(hc * a + c, 0.0)

    o_ref[...] = h


# ---------------------------------------------------------------------------
# Wrapper (mirror of EncoderModel.forward)
# ---------------------------------------------------------------------------
def encoder_forward(data, params):
    """Returns (inv_node_feat, equiv_node_feat, conv_args)."""
    x = data["x"]
    adj = data["adj"]
    n_nodes = x.shape[0]
    hdim = params["emb_w"].shape[1]

    inv_node_feat = pl.pallas_call(
        _encoder_kernel,
        out_shape=jax.ShapeDtypeStruct((n_nodes, hdim), jnp.float32),
        in_specs=[pl.BlockSpec(memory_space=pltpu.MemorySpace.VMEM)
                  for _ in range(6)],
        out_specs=pl.BlockSpec(memory_space=pltpu.MemorySpace.VMEM),
    )(
        x,                                   # [N, F_in] f32
        adj.astype(jnp.bfloat16),            # [N, N]    bf16 (0/1 exact)
        params["emb_w"],                     # [F_in, H] bf16
        params["emb_b"],                     # [1, H]    f32
        params["w_cat"],                     # [L, H, 2H] bf16
        params["gamma_beta"],                # [L, 2, H]  f32
    )

    equiv_node_feat = data["pos"]            # passed through unchanged
    conv_args = {"adj": adj}
    return inv_node_feat, equiv_node_feat, conv_args


# ---------------------------------------------------------------------------
# Pure-JAX reference (un-fused).  Includes a NONZERO GraphConv bias that the
# kernel never sees, demonstrating its exact cancellation under batch-stat BN.
# ---------------------------------------------------------------------------
def encoder_reference(data, params, *, mixed_precision=True):
    hdim = params["emb_w"].shape[1]

    def mm(a, b):
        if mixed_precision:                   # same numerics policy as kernel
            return jnp.dot(a.astype(jnp.bfloat16), b.astype(jnp.bfloat16),
                           preferred_element_type=jnp.float32)
        return jnp.dot(a.astype(jnp.float32), b.astype(jnp.float32))

    h = mm(data["x"], params["emb_w"]) + params["emb_b"]
    for l in range(params["w_cat"].shape[0]):
        xw = mm(h, params["w_cat"][l])
        hc = xw[:, :hdim] + mm(data["adj"], xw[:, hdim:]) + params["bias"][l]
        mean = jnp.mean(hc, axis=0, keepdims=True)
        var = jnp.maximum(jnp.mean(hc * hc, axis=0, keepdims=True)
                          - mean * mean, 0.0)
        gamma = params["gamma_beta"][l, 0:1, :]
        beta = params["gamma_beta"][l, 1:2, :]
        hn = gamma * ((hc - mean) * jax.lax.rsqrt(var + _EPS)) + beta
        h = jnp.maximum(hn, 0.0)
    return h


# ---------------------------------------------------------------------------
# Deterministic parameter / input construction
# ---------------------------------------------------------------------------
def make_params(key, f_in, hidden, num_layers):
    keys = jax.random.split(key, 2 + 5 * num_layers)
    emb_w = (0.1 * jax.random.normal(keys[0], (f_in, hidden))
             ).astype(jnp.bfloat16)
    emb_b = 0.1 * jax.random.normal(keys[1], (1, hidden), jnp.float32)
    w_cat, gamma_beta, bias = [], [], []
    for i in range(num_layers):
        k = keys[2 + 5 * i: 2 + 5 * (i + 1)]
        w_self = 0.1 * jax.random.normal(k[0], (hidden, hidden))
        w_neigh = 0.1 * jax.random.normal(k[1], (hidden, hidden))
        w_cat.append(jnp.concatenate([w_self, w_neigh], axis=1)
                     .astype(jnp.bfloat16))
        gamma = 1.0 + 0.1 * jax.random.normal(k[2], (1, hidden))
        beta = 0.1 * jax.random.normal(k[3], (1, hidden))
        gamma_beta.append(jnp.concatenate([gamma, beta], axis=0))   # [2, H]
        # Reference-only nonzero GraphConv bias (cancelled by batch-stat BN).
        bias.append(0.3 * jax.random.normal(k[4], (1, hidden)))
    return {
        "emb_w": emb_w,                                   # [F_in, H]  bf16
        "emb_b": emb_b,                                   # [1, H]     f32
        "w_cat": jnp.stack(w_cat),                        # [L, H, 2H] bf16
        "gamma_beta": jnp.stack(gamma_beta),              # [L, 2, H]  f32
        "bias": jnp.stack(bias),                          # [L, 1, H]  f32 (ref)
    }


def make_data(key, n_graphs, nodes_per_graph, f_in):
    n_nodes = n_graphs * nodes_per_graph
    kx, kp = jax.random.split(key)
    x = jax.random.normal(kx, (n_nodes, f_in), jnp.float32)
    pos = jax.random.normal(kp, (n_nodes, 3), jnp.float32)
    # Bidirectional ring per graph; graphs batched block-diagonally so the
    # node axis fills the MXU M dimension.
    src = jnp.arange(nodes_per_graph)
    dst = (src + 1) % nodes_per_graph
    ring = jnp.zeros((nodes_per_graph, nodes_per_graph), jnp.float32)
    ring = ring.at[dst, src].set(1.0)
    ring = ring.at[src, dst].set(1.0)
    adj = jnp.kron(jnp.eye(n_graphs, dtype=jnp.float32), ring)
    return {"x": x, "pos": pos, "adj": adj}


if __name__ == "__main__":
    # 4 graphs x 32 nodes = 128 node rows (sublane/MXU-friendly), hidden = 128
    # (lane-dense), 3 conv layers.
    N_GRAPHS, NODES_PER_GRAPH, F_IN, HIDDEN, N_LAYERS = 4, 32, 8, 128, 3

    root = jax.random.PRNGKey(0)
    k_data, k_param = jax.random.split(root)
    data = make_data(k_data, N_GRAPHS, NODES_PER_GRAPH, F_IN)
    params = make_params(k_param, F_IN, HIDDEN, N_LAYERS)

    inv, equiv, conv_args = encoder_forward(data, params)
    jax.block_until_ready(inv)
    jax.block_until_ready(equiv)

    n_nodes = N_GRAPHS * NODES_PER_GRAPH
    assert inv.shape == (n_nodes, HIDDEN)
    assert equiv.shape == (n_nodes, 3)
    assert conv_args["adj"].shape == (n_nodes, n_nodes)
    assert bool(jnp.all(jnp.isfinite(inv)))

    # (1) Policy-matched reference (bf16 matmul inputs, f32 accumulate):
    #     tight check of the fused kernel, and of the bias/BN cancellation
    #     (the reference adds a nonzero bias the kernel never sees).
    ref_mixed = encoder_reference(data, params, mixed_precision=True)
    jax.block_until_ready(ref_mixed)
    assert bool(jnp.allclose(inv, ref_mixed, rtol=1e-2, atol=1e-2)), \
        "Pallas output diverges from policy-matched JAX reference"

    # (2) Full-f32 reference: sanity bound on the bf16 numerics policy.
    ref_f32 = encoder_reference(data, params, mixed_precision=False)
    jax.block_until_ready(ref_f32)
    assert bool(jnp.allclose(inv, ref_f32, rtol=1e-1, atol=1e-1)), \
        "bf16 matmul policy drifted too far from the f32 reference"

    print("KERNEL_OK")
</pallas_src>

<mosaic_0001>
module attributes {stable_mosaic.version = 11 : i64} {
  func.func @_encoder_kernel(%arg0: memref<128x8xf32, #tpu.memory_space<vmem>>, %arg1: memref<128x128xbf16, #tpu.memory_space<vmem>>, %arg2: memref<8x128xbf16, #tpu.memory_space<vmem>>, %arg3: memref<1x128xf32, #tpu.memory_space<vmem>>, %arg4: memref<3x128x256xbf16, #tpu.memory_space<vmem>>, %arg5: memref<3x2x128xf32, #tpu.memory_space<vmem>>, %arg6: memref<128x128xf32, #tpu.memory_space<vmem>>) attributes {dimension_semantics = [], scalar_prefetch = 0 : i64, scratch_operands = 0 : i64, tpu.core_type = #tpu.core_type<tc>} {
    %c0 = arith.constant 0 : index
    %c0_0 = arith.constant 0 : index
    %0 = vector.load %arg1[%c0, %c0_0] : memref<128x128xbf16, #tpu.memory_space<vmem>>, vector<128x128xbf16>
    %c0_1 = arith.constant 0 : index
    %c0_2 = arith.constant 0 : index
    %1 = vector.load %arg0[%c0_1, %c0_2] : memref<128x8xf32, #tpu.memory_space<vmem>>, vector<128x8xf32>
    %2 = arith.truncf %1 : vector<128x8xf32> to vector<128x8xbf16>
    %c0_3 = arith.constant 0 : index
    %c0_4 = arith.constant 0 : index
    %3 = vector.load %arg2[%c0_3, %c0_4] : memref<8x128xbf16, #tpu.memory_space<vmem>>, vector<8x128xbf16>
    %cst = arith.constant dense<0.000000e+00> : vector<128x128xf32>
    %4 = tpu.matmul %2, %3, %cst {dimension_numbers = #tpu.dot_dimension_numbers<[1], [0], [0], [1], [0, 0, 1, 1], [], []>} : vector<128x8xbf16>, vector<8x128xbf16>, vector<128x128xf32> -> vector<128x128xf32>
    %c0_5 = arith.constant 0 : index
    %c0_6 = arith.constant 0 : index
    %5 = vector.load %arg3[%c0_5, %c0_6] : memref<1x128xf32, #tpu.memory_space<vmem>>, vector<1x128xf32>
    %6 = vector.broadcast %5 : vector<1x128xf32> to vector<128x128xf32>
    %7 = arith.addf %4, %6 : vector<128x128xf32>
    %c0_7 = arith.constant 0 : index
    %c0_8 = arith.constant 0 : index
    %c0_9 = arith.constant 0 : index
    %8 = vector.load %arg4[%c0_7, %c0_8, %c0_9] : memref<3x128x256xbf16, #tpu.memory_space<vmem>>, vector<1x128x256xbf16>
    %9 = vector.shape_cast %8 : vector<1x128x256xbf16> to vector<128x256xbf16>
    %c0_10 = arith.constant 0 : index
    %c0_11 = arith.constant 0 : index
    %c0_12 = arith.constant 0 : index
    %10 = vector.load %arg5[%c0_10, %c0_11, %c0_12] : memref<3x2x128xf32, #tpu.memory_space<vmem>>, vector<1x2x128xf32>
    %11 = vector.shape_cast %10 : vector<1x2x128xf32> to vector<2x128xf32>
    %12 = vector.extract_strided_slice %11 {offsets = [0, 0], sizes = [1, 128], strides = [1, 1]} : vector<2x128xf32> to vector<1x128xf32>
    %13 = vector.extract_strided_slice %11 {offsets = [1, 0], sizes = [1, 128], strides = [1, 1]} : vector<2x128xf32> to vector<1x128xf32>
    %14 = arith.truncf %7 : vector<128x128xf32> to vector<128x128xbf16>
    %cst_13 = arith.constant dense<0.000000e+00> : vector<128x256xf32>
    %15 = tpu.matmul %14, %9, %cst_13 {dimension_numbers = #tpu.dot_dimension_numbers<[1], [0], [0], [1], [0, 0, 1, 1], [], []>} : vector<128x128xbf16>, vector<128x256xbf16>, vector<128x256xf32> -> vector<128x256xf32>
    %16 = vector.extract_strided_slice %15 {offsets = [0, 0], sizes = [128, 128], strides = [1, 1]} : vector<128x256xf32> to vector<128x128xf32>
    %17 = vector.extract_strided_slice %15 {offsets = [0, 128], sizes = [128, 128], strides = [1, 1]} : vector<128x256xf32> to vector<128x128xf32>
    %18 = arith.truncf %17 : vector<128x128xf32> to vector<128x128xbf16>
    %cst_14 = arith.constant dense<0.000000e+00> : vector<128x128xf32>
    %19 = tpu.matmul %0, %18, %cst_14 {dimension_numbers = #tpu.dot_dimension_numbers<[1], [0], [0], [1], [0, 0, 1, 1], [], []>} : vector<128x128xbf16>, vector<128x128xbf16>, vector<128x128xf32> -> vector<128x128xf32>
    %20 = arith.addf %16, %19 : vector<128x128xf32>
    %21 = arith.mulf %20, %20 : vector<128x128xf32>
    %22 = tpu.concatenate %20, %21 in 1 : vector<128x128xf32>, vector<128x128xf32> -> vector<128x256xf32>
    %cst_15 = arith.constant dense<0.000000e+00> : vector<256xf32>
    %23 = vector.multi_reduction <add>, %22, %cst_15 [0] : vector<128x256xf32> to vector<256xf32>
    %24 = vector.shape_cast %23 : vector<256xf32> to vector<1x256xf32>
    %25 = vector.extract_strided_slice %24 {offsets = [0, 0], sizes = [1, 128], strides = [1, 1]} : vector<1x256xf32> to vector<1x128xf32>
    %cst_16 = arith.constant 7.812500e-03 : f32
    %26 = vector.broadcast %cst_16 : f32 to vector<1x128xf32>
    %27 = arith.mulf %25, %26 : vector<1x128xf32>
    %28 = vector.extract_strided_slice %24 {offsets = [0, 128], sizes = [1, 128], strides = [1, 1]} : vector<1x256xf32> to vector<1x128xf32>
    %cst_17 = arith.constant 7.812500e-03 : f32
    %29 = vector.broadcast %cst_17 : f32 to vector<1x128xf32>
    %30 = arith.mulf %28, %29 : vector<1x128xf32>
    %31 = arith.mulf %27, %27 : vector<1x128xf32>
    %32 = arith.subf %30, %31 : vector<1x128xf32>
    %cst_18 = arith.constant 0.000000e+00 : f32
    %33 = vector.broadcast %cst_18 : f32 to vector<1x128xf32>
    %34 = arith.maximumf %32, %33 : vector<1x128xf32>
    %cst_19 = arith.constant 9.99999974E-6 : f32
    %35 = vector.broadcast %cst_19 : f32 to vector<1x128xf32>
    %36 = arith.addf %34, %35 : vector<1x128xf32>
    %37 = math.rsqrt %36 : vector<1x128xf32>
    %38 = arith.mulf %12, %37 : vector<1x128xf32>
    %39 = arith.mulf %27, %38 : vector<1x128xf32>
    %40 = arith.subf %13, %39 : vector<1x128xf32>
    %41 = vector.broadcast %38 : vector<1x128xf32> to vector<128x128xf32>
    %42 = arith.mulf %20, %41 : vector<128x128xf32>
    %43 = vector.broadcast %40 : vector<1x128xf32> to vector<128x128xf32>
    %44 = arith.addf %42, %43 : vector<128x128xf32>
    %cst_20 = arith.constant 0.000000e+00 : f32
    %45 = vector.broadcast %cst_20 : f32 to vector<128x128xf32>
    %46 = arith.maximumf %44, %45 : vector<128x128xf32>
    %c1 = arith.constant 1 : index
    %c0_21 = arith.constant 0 : index
    %c0_22 = arith.constant 0 : index
    %47 = vector.load %arg4[%c1, %c0_21, %c0_22] : memref<3x128x256xbf16, #tpu.memory_space<vmem>>, vector<1x128x256xbf16>
    %48 = vector.shape_cast %47 : vector<1x128x256xbf16> to vector<128x256xbf16>
    %c1_23 = arith.constant 1 : index
    %c0_24 = arith.constant 0 : index
    %c0_25 = arith.constant 0 : index
    %49 = vector.load %arg5[%c1_23, %c0_24, %c0_25] : memref<3x2x128xf32, #tpu.memory_space<vmem>>, vector<1x2x128xf32>
    %50 = vector.shape_cast %49 : vector<1x2x128xf32> to vector<2x128xf32>
    %51 = vector.extract_strided_slice %50 {offsets = [0, 0], sizes = [1, 128], strides = [1, 1]} : vector<2x128xf32> to vector<1x128xf32>
    %52 = vector.extract_strided_slice %50 {offsets = [1, 0], sizes = [1, 128], strides = [1, 1]} : vector<2x128xf32> to vector<1x128xf32>
    %53 = arith.truncf %46 : vector<128x128xf32> to vector<128x128xbf16>
    %cst_26 = arith.constant dense<0.000000e+00> : vector<128x256xf32>
    %54 = tpu.matmul %53, %48, %cst_26 {dimension_numbers = #tpu.dot_dimension_numbers<[1], [0], [0], [1], [0, 0, 1, 1], [], []>} : vector<128x128xbf16>, vector<128x256xbf16>, vector<128x256xf32> -> vector<128x256xf32>
    %55 = vector.extract_strided_slice %54 {offsets = [0, 0], sizes = [128, 128], strides = [1, 1]} : vector<128x256xf32> to vector<128x128xf32>
    %56 = vector.extract_strided_slice %54 {offsets = [0, 128], sizes = [128, 128], strides = [1, 1]} : vector<128x256xf32> to vector<128x128xf32>
    %57 = arith.truncf %56 : vector<128x128xf32> to vector<128x128xbf16>
    %cst_27 = arith.constant dense<0.000000e+00> : vector<128x128xf32>
    %58 = tpu.matmul %0, %57, %cst_27 {dimension_numbers = #tpu.dot_dimension_numbers<[1], [0], [0], [1], [0, 0, 1, 1], [], []>} : vector<128x128xbf16>, vector<128x128xbf16>, vector<128x128xf32> -> vector<128x128xf32>
    %59 = arith.addf %55, %58 : vector<128x128xf32>
    %60 = arith.mulf %59, %59 : vector<128x128xf32>
    %61 = tpu.concatenate %59, %60 in 1 : vector<128x128xf32>, vector<128x128xf32> -> vector<128x256xf32>
    %cst_28 = arith.constant dense<0.000000e+00> : vector<256xf32>
    %62 = vector.multi_reduction <add>, %61, %cst_28 [0] : vector<128x256xf32> to vector<256xf32>
    %63 = vector.shape_cast %62 : vector<256xf32> to vector<1x256xf32>
    %64 = vector.extract_strided_slice %63 {offsets = [0, 0], sizes = [1, 128], strides = [1, 1]} : vector<1x256xf32> to vector<1x128xf32>
    %cst_29 = arith.constant 7.812500e-03 : f32
    %65 = vector.broadcast %cst_29 : f32 to vector<1x128xf32>
    %66 = arith.mulf %64, %65 : vector<1x128xf32>
    %67 = vector.extract_strided_slice %63 {offsets = [0, 128], sizes = [1, 128], strides = [1, 1]} : vector<1x256xf32> to vector<1x128xf32>
    %cst_30 = arith.constant 7.812500e-03 : f32
    %68 = vector.broadcast %cst_30 : f32 to vector<1x128xf32>
    %69 = arith.mulf %67, %68 : vector<1x128xf32>
    %70 = arith.mulf %66, %66 : vector<1x128xf32>
    %71 = arith.subf %69, %70 : vector<1x128xf32>
    %cst_31 = arith.constant 0.000000e+00 : f32
    %72 = vector.broadcast %cst_31 : f32 to vector<1x128xf32>
    %73 = arith.maximumf %71, %72 : vector<1x128xf32>
    %cst_32 = arith.constant 9.99999974E-6 : f32
    %74 = vector.broadcast %cst_32 : f32 to vector<1x128xf32>
    %75 = arith.addf %73, %74 : vector<1x128xf32>
    %76 = math.rsqrt %75 : vector<1x128xf32>
    %77 = arith.mulf %51, %76 : vector<1x128xf32>
    %78 = arith.mulf %66, %77 : vector<1x128xf32>
    %79 = arith.subf %52, %78 : vector<1x128xf32>
    %80 = vector.broadcast %77 : vector<1x128xf32> to vector<128x128xf32>
    %81 = arith.mulf %59, %80 : vector<128x128xf32>
    %82 = vector.broadcast %79 : vector<1x128xf32> to vector<128x128xf32>
    %83 = arith.addf %81, %82 : vector<128x128xf32>
    %cst_33 = arith.constant 0.000000e+00 : f32
    %84 = vector.broadcast %cst_33 : f32 to vector<128x128xf32>
    %85 = arith.maximumf %83, %84 : vector<128x128xf32>
    %c2 = arith.constant 2 : index
    %c0_34 = arith.constant 0 : index
    %c0_35 = arith.constant 0 : index
    %86 = vector.load %arg4[%c2, %c0_34, %c0_35] : memref<3x128x256xbf16, #tpu.memory_space<vmem>>, vector<1x128x256xbf16>
    %87 = vector.shape_cast %86 : vector<1x128x256xbf16> to vector<128x256xbf16>
    %c2_36 = arith.constant 2 : index
    %c0_37 = arith.constant 0 : index
    %c0_38 = arith.constant 0 : index
    %88 = vector.load %arg5[%c2_36, %c0_37, %c0_38] : memref<3x2x128xf32, #tpu.memory_space<vmem>>, vector<1x2x128xf32>
    %89 = vector.shape_cast %88 : vector<1x2x128xf32> to vector<2x128xf32>
    %90 = vector.extract_strided_slice %89 {offsets = [0, 0], sizes = [1, 128], strides = [1, 1]} : vector<2x128xf32> to vector<1x128xf32>
    %91 = vector.extract_strided_slice %89 {offsets = [1, 0], sizes = [1, 128], strides = [1, 1]} : vector<2x128xf32> to vector<1x128xf32>
    %92 = arith.truncf %85 : vector<128x128xf32> to vector<128x128xbf16>
    %cst_39 = arith.constant dense<0.000000e+00> : vector<128x256xf32>
    %93 = tpu.matmul %92, %87, %cst_39 {dimension_numbers = #tpu.dot_dimension_numbers<[1], [0], [0], [1], [0, 0, 1, 1], [], []>} : vector<128x128xbf16>, vector<128x256xbf16>, vector<128x256xf32> -> vector<128x256xf32>
    %94 = vector.extract_strided_slice %93 {offsets = [0, 0], sizes = [128, 128], strides = [1, 1]} : vector<128x256xf32> to vector<128x128xf32>
    %95 = vector.extract_strided_slice %93 {offsets = [0, 128], sizes = [128, 128], strides = [1, 1]} : vector<128x256xf32> to vector<128x128xf32>
    %96 = arith.truncf %95 : vector<128x128xf32> to vector<128x128xbf16>
    %cst_40 = arith.constant dense<0.000000e+00> : vector<128x128xf32>
    %97 = tpu.matmul %0, %96, %cst_40 {dimension_numbers = #tpu.dot_dimension_numbers<[1], [0], [0], [1], [0, 0, 1, 1], [], []>} : vector<128x128xbf16>, vector<128x128xbf16>, vector<128x128xf32> -> vector<128x128xf32>
    %98 = arith.addf %94, %97 : vector<128x128xf32>
    %99 = arith.mulf %98, %98 : vector<128x128xf32>
    %100 = tpu.concatenate %98, %99 in 1 : vector<128x128xf32>, vector<128x128xf32> -> vector<128x256xf32>
    %cst_41 = arith.constant dense<0.000000e+00> : vector<256xf32>
    %101 = vector.multi_reduction <add>, %100, %cst_41 [0] : vector<128x256xf32> to vector<256xf32>
    %102 = vector.shape_cast %101 : vector<256xf32> to vector<1x256xf32>
    %103 = vector.extract_strided_slice %102 {offsets = [0, 0], sizes = [1, 128], strides = [1, 1]} : vector<1x256xf32> to vector<1x128xf32>
    %cst_42 = arith.constant 7.812500e-03 : f32
    %104 = vector.broadcast %cst_42 : f32 to vector<1x128xf32>
    %105 = arith.mulf %103, %104 : vector<1x128xf32>
    %106 = vector.extract_strided_slice %102 {offsets = [0, 128], sizes = [1, 128], strides = [1, 1]} : vector<1x256xf32> to vector<1x128xf32>
    %cst_43 = arith.constant 7.812500e-03 : f32
    %107 = vector.broadcast %cst_43 : f32 to vector<1x128xf32>
    %108 = arith.mulf %106, %107 : vector<1x128xf32>
    %109 = arith.mulf %105, %105 : vector<1x128xf32>
    %110 = arith.subf %108, %109 : vector<1x128xf32>
    %cst_44 = arith.constant 0.000000e+00 : f32
    %111 = vector.broadcast %cst_44 : f32 to vector<1x128xf32>
    %112 = arith.maximumf %110, %111 : vector<1x128xf32>
    %cst_45 = arith.constant 9.99999974E-6 : f32
    %113 = vector.broadcast %cst_45 : f32 to vector<1x128xf32>
    %114 = arith.addf %112, %113 : vector<1x128xf32>
    %115 = math.rsqrt %114 : vector<1x128xf32>
    %116 = arith.mulf %90, %115 : vector<1x128xf32>
    %117 = arith.mulf %105, %116 : vector<1x128xf32>
    %118 = arith.subf %91, %117 : vector<1x128xf32>
    %119 = vector.broadcast %116 : vector<1x128xf32> to vector<128x128xf32>
    %120 = arith.mulf %98, %119 : vector<128x128xf32>
    %121 = vector.broadcast %118 : vector<1x128xf32> to vector<128x128xf32>
    %122 = arith.addf %120, %121 : vector<128x128xf32>
    %cst_46 = arith.constant 0.000000e+00 : f32
    %123 = vector.broadcast %cst_46 : f32 to vector<128x128xf32>
    %124 = arith.maximumf %122, %123 : vector<128x128xf32>
    %c0_47 = arith.constant 0 : index
    %c0_48 = arith.constant 0 : index
    %125 = vector.load %arg6[%c0_47, %c0_48] : memref<128x128xf32, #tpu.memory_space<vmem>>, vector<128x128xf32>
    tpu.vector_store %arg6[%c0_47, %c0_48], %124 {strides = array<i32>} : memref<128x128xf32, #tpu.memory_space<vmem>>, vector<128x128xf32>,
    return
  }
}

</mosaic_0001>

<bundles_post_ra>
// kernel: tpu_custom_call.1
= control target key start
LH: loop header
LB: loop body
LE: loop exit
PB: predicated region body
PF: predicated region fallthrough
CT: control target
= control target key end

     0   :  { %11 = vsyncpa [#allocation3], 0  ;;  %s2712_s0 = inlined_call_operand.vmem [shape: f32[128,8], index: 0, kind: input, shape index: {}]   ;;  %s2713_s1 = inlined_call_operand.vmem [shape: bf16[128,128], index: 1, kind: input, shape index: {}]   ;;  %s2714_s2 = inlined_call_operand.vmem [shape: bf16[8,128], index: 2, kind: input, shape index: {}]   ;;  %s2715_s3 = inlined_call_operand.vmem [shape: f32[1,128], index: 3, kind: input, shape index: {}]   ;;  %s2716_s4 = inlined_call_operand.hbm [shape: bf16[3,128,256], index: 4, kind: input, shape index: {}]   ;;  %s2717_s5 = inlined_call_operand.vmem [shape: f32[3,2,128], index: 5, kind: input, shape index: {}]   ;;  %s2718_s6 = inlined_call_operand.hbm [shape: f32[128,128], index: 6, kind: output, shape index: {}]  }
   0x1   :  { %12 = vsyncpa [#allocation4], 0  ;;  %s2081_s21 = smov [#allocation2]   ;;  %s2033_s25 = scalar_lea.hbm %s2716_s4, 6144 }
   0x2   :  { %s26_s22 = sshll.u32 %s2081_s21, 4  ;;  %p2034_p0 = scmp.ne.s32.totalorder %s2716_s4, %s2033_s25  ;;  %s27_s22 = int_to_ptr.vmem [resolvable:$true] %s26_s22 }
   0x3   :  { %p2037_p1 = scmp.lt.u32.totalorder %s2033_s25, %s2716_s4 }
   0x5   :  { %p2039_p2 = pnand %p2037_p1, %p2034_p0 }
   0x7   :  { %2042 = shalt.err (!%p2039_p2)
}
   0x8   :  { %s2043_s30 = scalar_lea.vmem %s27_s22, 6144  ;;  %p2048_p4 = scmp.lt.s32.totalorder %s27_s22, %s27_s22 }
   0x9   :  { %p2044_p3 = scmp.ne.s32.totalorder %s27_s22, %s2043_s30  ;;  %p2049_p5 = scmp.lt.s32.totalorder %s2043_s30, %s2043_s30 }
   0xb   :  { %p2050_p6 = por %p2049_p5, %p2048_p4 }
   0xd   :  { %p2051_p7 = pnand %p2050_p6, %p2044_p3 }
   0xf   :  { %2054 = shalt.err (!%p2051_p7)
}
  0x10   :  { %s2082_s7 = smov 128   ;;  %s2083_s8 = smov 8  }
  0x11   :  { %32 = dma.hbm_to_vmem [thread:$0]  %s2716_s4, 6144, %s27_s22, [#allocation3], %s2082_s7, %s2082_s7, %s2083_s8  }
  0x12   :  { %2077 = dma.done.wait [#allocation3], 6144  }
  0x13   :  { %2078 = vsyncadd [#allocation3], 4294961152  ;;  %vm112_vm0 = vcmask 1043456   ;;  %v79_v0 = vld [vmem:[%s2714_s2] sm:$0xf]  ;;  %v56_v2 = vld [vmem:[%s2712_s0 + $0x8] sm:$0xff] }
  0x14   :  { %v55_v1 = vld [vmem:[%s2712_s0] sm:$0xff]  ;;  %vm87_vm1 = vcmask 64512   ;;  %1934 = vmatprep.subr.msk.bf16.mxu0 %vm112_vm0, %v79_v0  ;;  %v114_v3 = vsel %vm112_vm0, %v79_v0, 0  ;;  %v57_v5 = vld [vmem:[%s2712_s0 + $0x10] sm:$0xff]  ;;  %v58_v6 = vld [vmem:[%s2712_s0 + $0x18] sm:$0xff]  ;;  %v2084_v42 = vmov 0  }
  0x15   :  { %v71_v4 = vpack.c.bf16 %v56_v2, %v55_v1  ;;  %v59_v7 = vld [vmem:[%s2712_s0 + $0x20] sm:$0xff]  ;;  %1821 = vmatpush3.bf16.msra.mxu0 %v114_v3  ;;  %v72_v8 = vpack.c.bf16 %v58_v6, %v57_v5  ;;  %v60_v9 = vld [vmem:[%s2712_s0 + $0x28] sm:$0xff]  ;;  %v61_v11 = vld [vmem:[%s2712_s0 + $0x30] sm:$0xff]  ;;  %350 = vmatprep.mubr.bf16.mxu1 %v2084_v42 }
  0x16   :  { %v73_v10 = vpack.c.bf16 %v60_v9, %v59_v7  ;;  %v62_v12 = vld [vmem:[%s2712_s0 + $0x38] sm:$0xff]  ;;  %v63_v13 = vld [vmem:[%s2712_s0 + $0x40] sm:$0xff]  ;;  %v64_v14 = vld [vmem:[%s2712_s0 + $0x48] sm:$0xff] }
  0x17   :  { %1822 = vmatprep.mubr.msk.bf16.mxu0 %vm87_vm1, %v71_v4  ;;  %v1940_v15 = vld [vmem:[#allocation2 + $0x4] ss:$8 sps:$4 sm:$0xff]   ;;  %v1942_v16 = vld [vmem:[#allocation2] ss:$8 sps:$4 sm:$0xff]   ;;  %v1943_v17 = vld [vmem:[#allocation2 + $0x14] ss:$8 sps:$4 sm:$0xff]   ;;  %v74_v18 = vpack.c.bf16 %v62_v12, %v61_v11  ;;  %v75_v20 = vpack.c.bf16 %v64_v14, %v63_v13 }
  0x18   :  { %1823 = vmatmul.mubr.msk.bf16.vlgmr.msra.gmra.mrb[0].mxu0 %vm87_vm1, %v72_v8  ;;  %318 = vmatprep.subr.bf16.mxu1 %v1940_v15  ;;  %v1945_v19 = vld [vmem:[#allocation2 + $0x10] ss:$8 sps:$4 sm:$0xff]   ;;  %v1946_v21 = vld [vmem:[#allocation2 + $0x24] ss:$8 sps:$4 sm:$0xff]   ;;  %v1948_v26 = vld [vmem:[#allocation2 + $0x20] ss:$8 sps:$4 sm:$0xff]  }
  0x19   :  { %1826 = vmatprep.mubr.msk.bf16.mxu0 %vm87_vm1, %v73_v10  ;;  %319 = vmatpush1.bf16.msra.mxu1 %v1942_v16  ;;  %v65_v22 = vld [vmem:[%s2712_s0 + $0x50] sm:$0xff]  ;;  %v66_v23 = vld [vmem:[%s2712_s0 + $0x58] sm:$0xff]  ;;  %v67_v24 = vld [vmem:[%s2712_s0 + $0x60] sm:$0xff] }
  0x1a   :  { %320 = vmatprep.subr.bf16.mxu1 %v1943_v17  ;;  %v68_v25 = vld [vmem:[%s2712_s0 + $0x68] sm:$0xff]  ;;  %v1949_v27 = vld [vmem:[#allocation2 + $0x34] ss:$8 sps:$4 sm:$0xff]   ;;  %v1951_v28 = vld [vmem:[#allocation2 + $0x30] ss:$8 sps:$4 sm:$0xff]   ;;  %v76_v30 = vpack.c.bf16 %v66_v23, %v65_v22 }
  0x1b   :  { %v1952_v29 = vld [vmem:[#allocation2 + $0x44] ss:$8 sps:$4 sm:$0xff]   ;;  %v77_v31 = vpack.c.bf16 %v68_v25, %v67_v24  ;;  %v1954_v32 = vld [vmem:[#allocation2 + $0x40] ss:$8 sps:$4 sm:$0xff]   ;;  %v69_v33 = vld [vmem:[%s2712_s0 + $0x70] sm:$0xff] }
  0x1c   :  { %v70_v34 = vld [vmem:[%s2712_s0 + $0x78] sm:$0xff]  ;;  %v1958_v38 = vld [vmem:[#allocation2 + $0x64] ss:$8 sps:$4 sm:$0xff]   ;;  %v1960_v39 = vld [vmem:[#allocation2 + $0x60] ss:$8 sps:$4 sm:$0xff]  }
  0x1d   :  { %321 = vmatpush1.bf16.msra.mxu1 %v1945_v19  ;;  %v1955_v35 = vld [vmem:[#allocation2 + $0x54] ss:$8 sps:$4 sm:$0xff]   ;;  %v1957_v36 = vld [vmem:[#allocation2 + $0x50] ss:$8 sps:$4 sm:$0xff]   ;;  %v78_v37 = vpack.c.bf16 %v70_v34, %v69_v33  ;;  %v1696_v44 = vld [vmem:[%s2715_s3] ss:$0 sm:$0xff] }
  0x1e   :  { %322 = vmatprep.subr.bf16.mxu1 %v1946_v21  ;;  %v1961_v40 = vld [vmem:[#allocation2 + $0x74] ss:$8 sps:$4 sm:$0xff]   ;;  %v1963_v41 = vld [vmem:[#allocation2 + $0x70] ss:$8 sps:$4 sm:$0xff]  }
  0x20   :  { %1827 = vmatmul.mubr.msk.bf16.gmra.mrb[4].mxu0 %vm87_vm1, %v74_v18 }
  0x21   :  { %1830 = vmatprep.mubr.msk.bf16.mxu0 %vm87_vm1, %v75_v20  ;;  %323 = vmatpush1.bf16.msra.mxu1 %v1948_v26  ;;  %v2209_v20 = vld [vmem:[%s2713_s1] sm:$0xff]  }
  0x22   :  { %324 = vmatprep.subr.bf16.mxu1 %v1949_v27 }
  0x25   :  { %325 = vmatpush1.bf16.msra.mxu1 %v1951_v28 }
  0x26   :  { %326 = vmatprep.subr.bf16.mxu1 %v1952_v29 }
  0x28   :  { %1831 = vmatmul.mubr.msk.bf16.gmra.mrb[8].mxu0 %vm87_vm1, %v76_v30 }
  0x29   :  { %1834 = vmatprep.mubr.msk.bf16.mxu0 %vm87_vm1, %v77_v31  ;;  %327 = vmatpush1.bf16.msra.mxu1 %v1954_v32 }
  0x2a   :  { %328 = vmatprep.subr.bf16.mxu1 %v1955_v35 }
  0x2d   :  { %329 = vmatpush1.bf16.msra.mxu1 %v1957_v36 }
  0x2e   :  { %330 = vmatprep.subr.bf16.mxu1 %v1958_v38 }
  0x30   :  { %1835 = vmatmul.mubr.msk.bf16.gmra.mrb[12].mxu0 %vm87_vm1, %v78_v37 }
  0x31   :  { %331 = vmatpush1.bf16.msra.mxu1 %v1960_v39  ;;  %1854 = vmatprep.mubr.bf16.mxu0 %v2209_v20 }
  0x32   :  { %332 = vmatprep.subr.bf16.mxu1 %v1961_v40 }
  0x35   :  { %333 = vmatpush1.bf16.msra.mxu1 %v1963_v41 }
  0xeb   :  { %v1824_v43 = vpop.f32.mrb[0].mxu0 }
  0xec   :  { %v150_v45 = vpop.f32.mrb[1].mxu0  ;;  %v159_v47 = vadd.f32 %v1824_v43, %v1696_v44 }
  0xed   :  { %v1825_v46 = vpop.f32.mrb[2].mxu0  ;;  %v151_v50 = vadd.f32 %v1696_v44, %v150_v45 }
  0xee   :  { %v162_v48 = vadd.f32 %v1825_v46, %v1696_v44  ;;  %v153_v49 = vpop.f32.mrb[3].mxu0 }
  0xef   :  { %v154_v51 = vadd.f32 %v1696_v44, %v153_v49 }
  0xf0   :  { %v231_v52 = vpack.c.bf16 %v162_v48, %v159_v47 }
  0xf1   :  { %v230_v53 = vpack.c.bf16 %v154_v51, %v151_v50 }
  0xf3   :  { %351 = vmatmul.mubr.bf16.vlgmr.msra.gmra.mrb[0].mxu1 %v230_v53  ;;  %v1828_v54 = vpop.f32.mrb[4].mxu0 }
  0xf4   :  { %v175_v55 = vadd.f32 %v1828_v54, %v1696_v44  ;;  %v166_v56 = vpop.f32.mrb[5].mxu0  ;;  %360 = vmatprep.mubr.bf16.mxu1 %v2084_v42 }
  0xf5   :  { %v167_v57 = vadd.f32 %v1696_v44, %v166_v56  ;;  %v1829_v58 = vpop.f32.mrb[6].mxu0 }
  0xf6   :  { %v178_v59 = vadd.f32 %v1829_v58, %v1696_v44  ;;  %v169_v60 = vpop.f32.mrb[7].mxu0 }
  0xf7   :  { %v170_v61 = vadd.f32 %v1696_v44, %v169_v60 }
  0xf8   :  { %v233_v62 = vpack.c.bf16 %v178_v59, %v175_v55 }
  0xf9   :  { %v232_v63 = vpack.c.bf16 %v170_v61, %v167_v57 }
  0xfb   :  { %361 = vmatmul.mubr.bf16.gmra.mrb[4].mxu1 %v231_v52  ;;  %v1832_v0 = vpop.f32.mrb[8].mxu0 }
  0xfc   :  { %370 = vmatprep.mubr.bf16.mxu1 %v2084_v42  ;;  %v191_v1 = vadd.f32 %v1832_v0, %v1696_v44  ;;  %v182_v2 = vpop.f32.mrb[9].mxu0  ;;  %v2260_v0 = vld [vmem:[%s2713_s1 + $0x18] sm:$0xff]  }
  0xfd   :  { %v183_v3 = vadd.f32 %v1696_v44, %v182_v2  ;;  %v1833_v4 = vpop.f32.mrb[10].mxu0  ;;  %v2272_v2 = vld [vmem:[%s2713_s1 + $0x28] sm:$0xff]  }
  0xfe   :  { %v194_v5 = vadd.f32 %v1833_v4, %v1696_v44  ;;  %v185_v6 = vpop.f32.mrb[11].mxu0  ;;  %v2284_v4 = vld [vmem:[%s2713_s1 + $0x38] sm:$0xff]  }
  0xff   :  { %v186_v7 = vadd.f32 %v1696_v44, %v185_v6  ;;  %v1972_v6 = vld [vmem:[#allocation2 + $0x80] ss:$8 sps:$4 sm:$0xff]  }
 0x100   :  { %v235_v8 = vpack.c.bf16 %v194_v5, %v191_v1  ;;  %v2265_v1 = vld [vmem:[%s2713_s1 + $0x20] sm:$0xff]  }
 0x101   :  { %v234_v9 = vpack.c.bf16 %v186_v7, %v183_v3  ;;  %v2277_v3 = vld [vmem:[%s2713_s1 + $0x30] sm:$0xff]   ;;  %v1974_v5 = vld [vmem:[#allocation2 + $0x84] ss:$8 sps:$4 sm:$0xff]  }
 0x102   :  { %v1977_v7 = vld [vmem:[#allocation2 + $0x94] ss:$8 sps:$4 sm:$0xff]  }
 0x103   :  { %371 = vmatmul.mubr.bf16.gmra.mrb[8].mxu1 %v232_v63  ;;  %v1836_v10 = vpop.f32.mrb[12].mxu0  ;;  %v2253_v63 = vld [vmem:[%s2713_s1 + $0x10] sm:$0xff]  }
 0x104   :  { %380 = vmatprep.mubr.bf16.mxu1 %v2084_v42  ;;  %v207_v11 = vadd.f32 %v1836_v10, %v1696_v44  ;;  %v198_v12 = vpop.f32.mrb[13].mxu0  ;;  %v1978_v10 = vld [vmem:[#allocation2 + $0xa0] ss:$8 sps:$4 sm:$0xff]  }
 0x105   :  { %v199_v13 = vadd.f32 %v1696_v44, %v198_v12  ;;  %v1837_v14 = vpop.f32.mrb[14].mxu0  ;;  %v1981_v12 = vld [vmem:[#allocation2 + $0xb0] ss:$8 sps:$4 sm:$0xff]  }
 0x106   :  { %v210_v15 = vadd.f32 %v1837_v14, %v1696_v44  ;;  %v201_v16 = vpop.f32.mrb[15].mxu0  ;;  %v1984_v14 = vld [vmem:[#allocation2 + $0xc0] ss:$8 sps:$4 sm:$0xff]  }
 0x107   :  { %v202_v17 = vadd.f32 %v1696_v44, %v201_v16  ;;  %v1987_v16 = vld [vmem:[#allocation2 + $0xd0] ss:$8 sps:$4 sm:$0xff]  }
 0x108   :  { %v237_v18 = vpack.c.bf16 %v210_v15, %v207_v11  ;;  %v1983_v11 = vld [vmem:[#allocation2 + $0xb4] ss:$8 sps:$4 sm:$0xff]  }
 0x109   :  { %v236_v19 = vpack.c.bf16 %v202_v17, %v199_v13  ;;  %v1986_v13 = vld [vmem:[#allocation2 + $0xc4] ss:$8 sps:$4 sm:$0xff]   ;;  %v1989_v15 = vld [vmem:[#allocation2 + $0xd4] ss:$8 sps:$4 sm:$0xff]  }
 0x10a   :  { %v1992_v17 = vld [vmem:[#allocation2 + $0xe4] ss:$8 sps:$4 sm:$0xff]  }
 0x10b   :  { %381 = vmatmul.mubr.bf16.gmra.mrb[12].mxu1 %v233_v62  ;;  %v2248_v62 = vld [vmem:[%s2713_s1 + $0x8] sm:$0xff]  }
 0x10c   :  { %390 = vmatprep.mubr.bf16.mxu1 %v2084_v42 }
 0x113   :  { %391 = vmatmul.mubr.bf16.gmra.mrb[16].mxu1 %v234_v9  ;;  %v1980_v9 = vld [vmem:[#allocation2 + $0xa4] ss:$8 sps:$4 sm:$0xff]  }
 0x114   :  { %400 = vmatprep.mubr.bf16.mxu1 %v2084_v42 }
 0x11b   :  { %401 = vmatmul.mubr.bf16.gmra.mrb[20].mxu1 %v235_v8  ;;  %v1975_v8 = vld [vmem:[#allocation2 + $0x90] ss:$8 sps:$4 sm:$0xff]  }
 0x11c   :  { %410 = vmatprep.mubr.bf16.mxu1 %v2084_v42 }
 0x123   :  { %411 = vmatmul.mubr.bf16.gmra.mrb[24].mxu1 %v236_v19  ;;  %v1995_v19 = vld [vmem:[#allocation2 + $0xf4] ss:$8 sps:$4 sm:$0xff]  }
 0x124   :  { %420 = vmatprep.mubr.bf16.mxu1 %v2084_v42 }
 0x12b   :  { %421 = vmatmul.mubr.bf16.gmra.mrb[28].mxu1 %v237_v18  ;;  %v1990_v18 = vld [vmem:[#allocation2 + $0xe0] ss:$8 sps:$4 sm:$0xff]  }
 0x12c   :  { %1886 = vmatprep.mubr.bf16.mxu1 %v2209_v20 }
 0x1c6   :  { %v2213_v21 = vpop.f32.mrb[0].mxu1 }
 0x1c7   :  { %v354_v22 = vpop.f32.mrb[1].mxu1 }
 0x1c8   :  { %v2215_v23 = vpop.f32.mrb[2].mxu1 }
 0x1c9   :  { %v358_v24 = vpop.f32.mrb[3].mxu1 }
 0x1ca   :  { %v431_v25 = vpack.c.bf16 %v358_v24, %v354_v22  ;;  %v1993_v22 = vld [vmem:[#allocation2 + $0xf0] ss:$8 sps:$4 sm:$0xff]  }
 0x1cc   :  { %1838 = vmatprep.subr.bf16.mxu0 %v431_v25 }
 0x1cd   :  { %1839 = vmatpush3.bf16.msra.mxu0 %v431_v25 }
 0x1ce   :  { %v2217_v26 = vpop.f32.mrb[4].mxu1 }
 0x1cf   :  { %v364_v27 = vpop.f32.mrb[5].mxu1 }
 0x1d0   :  { %v2219_v28 = vpop.f32.mrb[6].mxu1 }
 0x1d1   :  { %v368_v29 = vpop.f32.mrb[7].mxu1 }
 0x1d2   :  { %v432_v30 = vpack.c.bf16 %v368_v29, %v364_v27 }
 0x1d4   :  { %1840 = vmatprep.subr.bf16.mxu0 %v432_v30 }
 0x1d5   :  { %1841 = vmatpush3.bf16.msra.mxu0 %v432_v30 }
 0x1d6   :  { %v2221_v31 = vpop.f32.mrb[8].mxu1 }
 0x1d7   :  { %v374_v32 = vpop.f32.mrb[9].mxu1 }
 0x1d8   :  { %v2223_v33 = vpop.f32.mrb[10].mxu1 }
 0x1d9   :  { %v378_v34 = vpop.f32.mrb[11].mxu1 }
 0x1da   :  { %v433_v35 = vpack.c.bf16 %v378_v34, %v374_v32 }
 0x1dc   :  { %1842 = vmatprep.subr.bf16.mxu0 %v433_v35 }
 0x1dd   :  { %1843 = vmatpush3.bf16.msra.mxu0 %v433_v35 }
 0x1de   :  { %v2225_v36 = vpop.f32.mrb[12].mxu1 }
 0x1df   :  { %v384_v37 = vpop.f32.mrb[13].mxu1 }
 0x1e0   :  { %v2227_v38 = vpop.f32.mrb[14].mxu1 }
 0x1e1   :  { %v388_v39 = vpop.f32.mrb[15].mxu1 }
 0x1e2   :  { %v434_v40 = vpack.c.bf16 %v388_v39, %v384_v37 }
 0x1e4   :  { %1844 = vmatprep.subr.bf16.mxu0 %v434_v40 }
 0x1e5   :  { %1845 = vmatpush3.bf16.msra.mxu0 %v434_v40 }
 0x1e6   :  { %v2229_v41 = vpop.f32.mrb[16].mxu1 }
 0x1e7   :  { %v394_v43 = vpop.f32.mrb[17].mxu1 }
 0x1e8   :  { %v2231_v44 = vpop.f32.mrb[18].mxu1 }
 0x1e9   :  { %v398_v45 = vpop.f32.mrb[19].mxu1 }
 0x1ea   :  { %v435_v46 = vpack.c.bf16 %v398_v45, %v394_v43 }
 0x1ec   :  { %1846 = vmatprep.subr.bf16.mxu0 %v435_v46 }
 0x1ed   :  { %1847 = vmatpush3.bf16.msra.mxu0 %v435_v46 }
 0x1ee   :  { %v2233_v47 = vpop.f32.mrb[20].mxu1 }
 0x1ef   :  { %v404_v48 = vpop.f32.mrb[21].mxu1 }
 0x1f0   :  { %v2235_v49 = vpop.f32.mrb[22].mxu1 }
 0x1f1   :  { %v408_v50 = vpop.f32.mrb[23].mxu1 }
 0x1f2   :  { %v436_v51 = vpack.c.bf16 %v408_v50, %v404_v48 }
 0x1f4   :  { %1848 = vmatprep.subr.bf16.mxu0 %v436_v51 }
 0x1f5   :  { %1849 = vmatpush3.bf16.msra.mxu0 %v436_v51 }
 0x1f6   :  { %v2237_v52 = vpop.f32.mrb[24].mxu1 }
 0x1f7   :  { %v414_v53 = vpop.f32.mrb[25].mxu1 }
 0x1f8   :  { %v2239_v54 = vpop.f32.mrb[26].mxu1 }
 0x1f9   :  { %v418_v55 = vpop.f32.mrb[27].mxu1 }
 0x1fa   :  { %v437_v56 = vpack.c.bf16 %v418_v55, %v414_v53 }
 0x1fc   :  { %1850 = vmatprep.subr.bf16.mxu0 %v437_v56 }
 0x1fd   :  { %1851 = vmatpush3.bf16.msra.mxu0 %v437_v56 }
 0x1fe   :  { %v2241_v57 = vpop.f32.mrb[28].mxu1 }
 0x1ff   :  { %v424_v58 = vpop.f32.mrb[29].mxu1 }
 0x200   :  { %v2243_v59 = vpop.f32.mrb[30].mxu1 }
 0x201   :  { %v428_v60 = vpop.f32.mrb[31].mxu1 }
 0x202   :  { %v438_v61 = vpack.c.bf16 %v428_v60, %v424_v58 }
 0x204   :  { %1852 = vmatprep.subr.bf16.mxu0 %v438_v61 }
 0x205   :  { %1853 = vmatpush3.bf16.msra.mxu0 %v438_v61 }
 0x206   :  { %834 = vmatprep.subr.bf16.mxu0 %v1974_v5 }
 0x208   :  { %1855 = vmatmul.mubr.bf16.vlgmr.msra.gmra.mrb[16].mxu0 %v2248_v62 }
 0x209   :  { %1858 = vmatprep.mubr.bf16.mxu0 %v2253_v63  ;;  %835 = vmatpush1.bf16.msra.mxu0 %v1972_v6 }
 0x20a   :  { %836 = vmatprep.subr.bf16.mxu0 %v1977_v7 }
 0x20d   :  { %837 = vmatpush1.bf16.msra.mxu0 %v1975_v8 }
 0x20e   :  { %838 = vmatprep.subr.bf16.mxu0 %v1980_v9 }
 0x210   :  { %1859 = vmatmul.mubr.bf16.gmra.mrb[20].mxu0 %v2260_v0 }
 0x211   :  { %1862 = vmatprep.mubr.bf16.mxu0 %v2265_v1  ;;  %839 = vmatpush1.bf16.msra.mxu0 %v1978_v10 }
 0x212   :  { %840 = vmatprep.subr.bf16.mxu0 %v1983_v11 }
 0x215   :  { %841 = vmatpush1.bf16.msra.mxu0 %v1981_v12 }
 0x216   :  { %842 = vmatprep.subr.bf16.mxu0 %v1986_v13 }
 0x218   :  { %1863 = vmatmul.mubr.bf16.gmra.mrb[24].mxu0 %v2272_v2 }
 0x219   :  { %1866 = vmatprep.mubr.bf16.mxu0 %v2277_v3  ;;  %843 = vmatpush1.bf16.msra.mxu0 %v1984_v14 }
 0x21a   :  { %844 = vmatprep.subr.bf16.mxu0 %v1989_v15 }
 0x21d   :  { %845 = vmatpush1.bf16.msra.mxu0 %v1987_v16 }
 0x21e   :  { %846 = vmatprep.subr.bf16.mxu0 %v1992_v17 }
 0x220   :  { %1867 = vmatmul.mubr.bf16.gmra.mrb[28].mxu0 %v2284_v4 }
 0x221   :  { %866 = vmatprep.mubr.bf16.mxu0 %v2084_v42  ;;  %847 = vmatpush1.bf16.msra.mxu0 %v1990_v18 }
 0x222   :  { %848 = vmatprep.subr.bf16.mxu0 %v1995_v19 }
 0x225   :  { %849 = vmatpush1.bf16.msra.mxu0 %v1993_v22 }
 0x2db   :  { %v1856_v24 = vpop.f32.mrb[16].mxu0 }
 0x2dc   :  { %v2289_v25 = vadd.f32 %v1856_v24, %v2217_v26  ;;  %v521_v27 = vpop.f32.mrb[17].mxu0 }
 0x2dd   :  { %v2292_v29 = vadd.f32 %v521_v27, %v2213_v21  ;;  %v1857_v30 = vpop.f32.mrb[18].mxu0 }
 0x2de   :  { %v2295_v32 = vadd.f32 %v1857_v30, %v2219_v28  ;;  %v524_v34 = vpop.f32.mrb[19].mxu0  ;;  %v602_v21 = vmul.f32 %v2289_v25, %v2289_v25 }
 0x2df   :  { %v2298_v35 = vadd.f32 %v524_v34, %v2215_v23  ;;  %v600_v37 = vmul.f32 %v2292_v29, %v2292_v29 }
 0x2e0   :  { %v603_v46 = vmul.f32 %v2295_v32, %v2295_v32 }
 0x2e1   :  { %v601_v39 = vmul.f32 %v2298_v35, %v2298_v35  ;;  %v616_v26 = vadd.f32 %v2298_v35, %v2292_v29 }
 0x2e3   :  { %v617_v40 = vadd.f32 %v616_v26, %v2289_v25  ;;  %v637_v28 = vadd.f32 %v601_v39, %v600_v37  ;;  %v1860_v43 = vpop.f32.mrb[20].mxu0 }
 0x2e4   :  { %v2310_v45 = vadd.f32 %v1860_v43, %v2225_v36  ;;  %v537_v23 = vpop.f32.mrb[21].mxu0 }
 0x2e5   :  { %v638_v48 = vadd.f32 %v637_v28, %v602_v21  ;;  %v2315_v50 = vadd.f32 %v537_v23, %v2221_v31  ;;  %v618_v51 = vadd.f32 %v617_v40, %v2295_v32  ;;  %v1861_v53 = vpop.f32.mrb[22].mxu0 }
 0x2e6   :  { %v2319_v55 = vadd.f32 %v1861_v53, %v2227_v38  ;;  %v540_v56 = vpop.f32.mrb[23].mxu0  ;;  %v606_v38 = vmul.f32 %v2310_v45, %v2310_v45 }
 0x2e7   :  { %v604_v58 = vmul.f32 %v2315_v50, %v2315_v50  ;;  %v619_v36 = vadd.f32 %v618_v51, %v2315_v50  ;;  %v639_v60 = vadd.f32 %v638_v48, %v603_v46  ;;  %v2325_v61 = vadd.f32 %v540_v56, %v2223_v33 }
 0x2e8   :  { %v607_v33 = vmul.f32 %v2319_v55, %v2319_v55 }
 0x2e9   :  { %v640_v5 = vadd.f32 %v639_v60, %v604_v58  ;;  %v605_v31 = vmul.f32 %v2325_v61, %v2325_v61  ;;  %v620_v6 = vadd.f32 %v619_v36, %v2325_v61 }
 0x2eb   :  { %v621_v7 = vadd.f32 %v620_v6, %v2310_v45  ;;  %v641_v8 = vadd.f32 %v640_v5, %v605_v31  ;;  %v1864_v9 = vpop.f32.mrb[24].mxu0 }
 0x2ec   :  { %v2334_v10 = vadd.f32 %v1864_v9, %v2233_v47  ;;  %v553_v11 = vpop.f32.mrb[25].mxu0 }
 0x2ed   :  { %v642_v12 = vadd.f32 %v641_v8, %v606_v38  ;;  %v2339_v13 = vadd.f32 %v553_v11, %v2229_v41  ;;  %v622_v14 = vadd.f32 %v621_v7, %v2319_v55  ;;  %v1865_v15 = vpop.f32.mrb[26].mxu0 }
 0x2ee   :  { %v2343_v16 = vadd.f32 %v1865_v15, %v2235_v49  ;;  %v556_v17 = vpop.f32.mrb[27].mxu0  ;;  %v610_v49 = vmul.f32 %v2334_v10, %v2334_v10 }
 0x2ef   :  { %v608_v18 = vmul.f32 %v2339_v13, %v2339_v13  ;;  %v623_v47 = vadd.f32 %v622_v14, %v2339_v13  ;;  %v643_v19 = vadd.f32 %v642_v12, %v607_v33  ;;  %v2349_v22 = vadd.f32 %v556_v17, %v2231_v44 }
 0x2f0   :  { %v611_v44 = vmul.f32 %v2343_v16, %v2343_v16 }
 0x2f1   :  { %v644_v24 = vadd.f32 %v643_v19, %v608_v18  ;;  %v609_v41 = vmul.f32 %v2349_v22, %v2349_v22  ;;  %v624_v27 = vadd.f32 %v623_v47, %v2349_v22 }
 0x2f3   :  { %v625_v30 = vadd.f32 %v624_v27, %v2334_v10  ;;  %v645_v34 = vadd.f32 %v644_v24, %v609_v41  ;;  %v1868_v37 = vpop.f32.mrb[28].mxu0 }
 0x2f4   :  { %v2358_v39 = vadd.f32 %v1868_v37, %v2241_v57  ;;  %v569_v26 = vpop.f32.mrb[29].mxu0 }
 0x2f5   :  { %v646_v21 = vadd.f32 %v645_v34, %v610_v49  ;;  %v596_v40 = vadd.f32 %v569_v26, %v2237_v52  ;;  %v626_v28 = vadd.f32 %v625_v30, %v2343_v16  ;;  %v1869_v43 = vpop.f32.mrb[30].mxu0  ;;  %v671_v34 = vlaneseq  ;;  %v229_v26 = vld [vmem:[%s2717_s5] sm:$0x3] }
 0x2f6   :  { %v599_v23 = vadd.f32 %v1869_v43, %v2243_v59  ;;  %v572_v46 = vpop.f32.mrb[31].mxu0  ;;  %v614_v60 = vmul.f32 %v2358_v39, %v2358_v39 }
 0x2f7   :  { %v612_v48 = vmul.f32 %v596_v40, %v596_v40  ;;  %v627_v51 = vadd.f32 %v626_v28, %v596_v40  ;;  %v647_v53 = vadd.f32 %v646_v21, %v611_v44  ;;  %v597_v56 = vadd.f32 %v572_v46, %v2239_v54 }
 0x2f8   :  { %v615_v31 = vmul.f32 %v599_v23, %v599_v23  ;;  %v672_v37 = vshrl.u32 %v671_v34, 7 }
 0x2f9   :  { %v648_v57 = vadd.f32 %v647_v53, %v612_v48  ;;  %v613_v58 = vmul.f32 %v597_v56, %v597_v56  ;;  %v628_v36 = vadd.f32 %v627_v51, %v597_v56 }
 0x2fa   :  { %v2372_v44 = vsub.s32 0, %v672_v37  ;;  %v2375_v53 = vsub.s32 1, %v672_v37 }
 0x2fb   :  { %v629_v5 = vadd.f32 %v628_v36, %v2358_v39  ;;  %v649_v52 = vadd.f32 %v648_v57, %v613_v58 }
 0x2fd   :  { %v630_v6 = vadd.f32 %v629_v5, %v599_v23  ;;  %v650_v38 = vadd.f32 %v649_v52, %v614_v60 }
 0x2ff   :  { %v631_v7 = vrot.slane %v630_v6, 4  ;;  %v651_v59 = vadd.f32 %v650_v38, %v615_v31 }
 0x301   :  { %v632_v8 = vadd.f32 %v631_v7, %v630_v6  ;;  %v652_v9 = vrot.slane %v651_v59, 4 }
 0x303   :  { %v633_v11 = vrot.slane %v632_v8, 2  ;;  %v653_v33 = vadd.f32 %v652_v9, %v651_v59 }
 0x305   :  { %v634_v12 = vadd.f32 %v633_v11, %v632_v8  ;;  %v654_v54 = vrot.slane %v653_v33, 2 }
 0x307   :  { %v635_v14 = vrot.slane %v634_v12, 1  ;;  %v655_v15 = vadd.f32 %v654_v54, %v653_v33 }
 0x309   :  { %v636_v17 = vadd.f32 %v635_v14, %v634_v12  ;;  %v656_v18 = vrot.slane %v655_v15, 1 }
 0x30b   :  { %v657_v47 = vadd.f32 %v656_v18, %v655_v15  ;;  %v658_v19 = vmul.f32 0.0078125, %v636_v17 }
 0x30d   :  { %v659_v24 = vmul.f32 0.0078125, %v657_v47  ;;  %v660_v41 = vmul.f32 %v658_v19, %v658_v19 }
 0x30f   :  { %v661_v27 = vsub.f32 %v659_v24, %v660_v41 }
 0x311   :  { %v662_v49 = vmax.f32 %v661_v27, 0.0 }
 0x313   :  { %v663_v30 = vadd.f32 1e-05, %v662_v49 }
 0x315   :  { %2020 = vrsqrt.f32 %v663_v30 }
 0x31f   :  { %v2021_v21 = vpop.eup %2020 }
 0x320   :  { %v665_v28 = vmul.f32 %v2021_v21, %v229_v26 }
 0x322   :  { %v666_v43 = vmul.f32 %v665_v28, %v658_v19  ;;  %v674_v46 = vrot.slane %v665_v28, %v2372_v44 }
 0x324   :  { %v668_v48 = vrot.slane %v666_v43, 7  ;;  %v688_v51 = vmul.f32 %v674_v46, %v597_v56  ;;  %v675_v57 = vmul.f32 %v674_v46, %v2292_v29  ;;  %v676_v58 = vmul.f32 %v674_v46, %v2298_v35 }
 0x325   :  { %v677_v36 = vmul.f32 %v674_v46, %v2289_v25  ;;  %v679_v60 = vmul.f32 %v674_v46, %v2315_v50  ;;  %v680_v5 = vmul.f32 %v674_v46, %v2325_v61  ;;  %v681_v31 = vmul.f32 %v674_v46, %v2310_v45 }
 0x326   :  { %v670_v52 = vsub.f32 %v229_v26, %v668_v48  ;;  %v682_v6 = vmul.f32 %v674_v46, %v2319_v55  ;;  %v683_v38 = vmul.f32 %v674_v46, %v2339_v13  ;;  %v684_v56 = vmul.f32 %v674_v46, %v2349_v22 }
 0x327   :  { %v685_v7 = vmul.f32 %v674_v46, %v2334_v10  ;;  %v686_v29 = vmul.f32 %v674_v46, %v2343_v16  ;;  %v687_v35 = vmul.f32 %v674_v46, %v596_v40  ;;  %v678_v50 = vmul.f32 %v674_v46, %v2295_v32 }
 0x328   :  { %v694_v25 = vrot.slane %v670_v52, %v2375_v53  ;;  %v689_v61 = vmul.f32 %v674_v46, %v2358_v39  ;;  %v690_v59 = vmul.f32 %v674_v46, %v599_v23 }
 0x32a   :  { %v695_v8 = vadd.f32 %v694_v25, %v675_v57  ;;  %v696_v45 = vadd.f32 %v694_v25, %v676_v58  ;;  %v697_v9 = vadd.f32 %v694_v25, %v677_v36  ;;  %v698_v55 = vadd.f32 %v694_v25, %v678_v50 }
 0x32b   :  { %v699_v11 = vadd.f32 %v694_v25, %v679_v60  ;;  %v700_v13 = vadd.f32 %v694_v25, %v680_v5  ;;  %v701_v33 = vadd.f32 %v694_v25, %v681_v31  ;;  %v702_v22 = vadd.f32 %v694_v25, %v682_v6 }
 0x32c   :  { %v711_v12 = vmax.f32 %v695_v8, 0.0  ;;  %v712_v10 = vmax.f32 %v696_v45, 0.0  ;;  %v713_v54 = vmax.f32 %v697_v9, 0.0  ;;  %v714_v16 = vmax.f32 %v698_v55, 0.0 }
 0x32d   :  { %v715_v40 = vmax.f32 %v699_v11, 0.0  ;;  %v716_v14 = vmax.f32 %v700_v13, 0.0  ;;  %v717_v15 = vmax.f32 %v701_v33, 0.0  ;;  %v718_v17 = vmax.f32 %v702_v22, 0.0 }
 0x32e   :  { %v746_v32 = vpack.c.bf16 %v712_v10, %v711_v12  ;;  %v747_v18 = vpack.c.bf16 %v714_v16, %v713_v54  ;;  %v703_v39 = vadd.f32 %v694_v25, %v683_v38  ;;  %v704_v23 = vadd.f32 %v694_v25, %v684_v56 }
 0x32f   :  { %v748_v47 = vpack.c.bf16 %v716_v14, %v715_v40  ;;  %v749_v19 = vpack.c.bf16 %v718_v17, %v717_v15  ;;  %v705_v24 = vadd.f32 %v694_v25, %v685_v7  ;;  %v706_v41 = vadd.f32 %v694_v25, %v686_v29 }
 0x330   :  { %867 = vmatmul.mubr.bf16.vlgmr.msra.gmra.mrb[32].mxu0 %v746_v32  ;;  %v719_v27 = vmax.f32 %v703_v39, 0.0  ;;  %v720_v49 = vmax.f32 %v704_v23, 0.0  ;;  %v707_v30 = vadd.f32 %v694_v25, %v687_v35  ;;  %v708_v34 = vadd.f32 %v694_v25, %v688_v51 }
 0x331   :  { %876 = vmatprep.mubr.bf16.mxu0 %v2084_v42  ;;  %v721_v37 = vmax.f32 %v705_v24, 0.0  ;;  %v722_v26 = vmax.f32 %v706_v41, 0.0  ;;  %v709_v21 = vadd.f32 %v694_v25, %v689_v61  ;;  %v710_v28 = vadd.f32 %v694_v25, %v690_v59 }
 0x332   :  { %v750_v43 = vpack.c.bf16 %v720_v49, %v719_v27  ;;  %v723_v46 = vmax.f32 %v707_v30, 0.0  ;;  %v724_v48 = vmax.f32 %v708_v34, 0.0  ;;  %v1998_v30 = vld [vmem:[#allocation2 + $0x104] ss:$8 sps:$4 sm:$0xff]   ;;  %v1996_v34 = vld [vmem:[#allocation2 + $0x100] ss:$8 sps:$4 sm:$0xff]  }
 0x333   :  { %v751_v57 = vpack.c.bf16 %v722_v26, %v721_v37  ;;  %v725_v58 = vmax.f32 %v709_v21, 0.0  ;;  %v726_v36 = vmax.f32 %v710_v28, 0.0  ;;  %v2001_v37 = vld [vmem:[#allocation2 + $0x114] ss:$8 sps:$4 sm:$0xff]   ;;  %v2011_v26 = vld [vmem:[#allocation2 + $0x150] ss:$8 sps:$4 sm:$0xff]  }
 0x334   :  { %v752_v60 = vpack.c.bf16 %v724_v48, %v723_v46  ;;  %v2013_v21 = vld [vmem:[#allocation2 + $0x154] ss:$8 sps:$4 sm:$0xff]   ;;  %v2016_v28 = vld [vmem:[#allocation2 + $0x164] ss:$8 sps:$4 sm:$0xff]   ;;  %v2017_v48 = vld [vmem:[#allocation2 + $0x170] ss:$8 sps:$4 sm:$0xff]  }
 0x335   :  { %v753_v5 = vpack.c.bf16 %v726_v36, %v725_v58  ;;  %v2019_v46 = vld [vmem:[#allocation2 + $0x174] ss:$8 sps:$4 sm:$0xff]  }
 0x338   :  { %877 = vmatmul.mubr.bf16.gmra.mrb[36].mxu0 %v747_v18 }
 0x339   :  { %886 = vmatprep.mubr.bf16.mxu0 %v2084_v42 }
 0x340   :  { %887 = vmatmul.mubr.bf16.gmra.mrb[40].mxu0 %v748_v47 }
 0x341   :  { %896 = vmatprep.mubr.bf16.mxu0 %v2084_v42 }
 0x348   :  { %897 = vmatmul.mubr.bf16.gmra.mrb[44].mxu0 %v749_v19 }
 0x349   :  { %906 = vmatprep.mubr.bf16.mxu0 %v2084_v42 }
 0x350   :  { %907 = vmatmul.mubr.bf16.gmra.mrb[48].mxu0 %v750_v43  ;;  %v2014_v43 = vld [vmem:[#allocation2 + $0x160] ss:$8 sps:$4 sm:$0xff]  }
 0x351   :  { %916 = vmatprep.mubr.bf16.mxu0 %v2084_v42 }
 0x358   :  { %917 = vmatmul.mubr.bf16.gmra.mrb[52].mxu0 %v751_v57 }
 0x359   :  { %926 = vmatprep.mubr.bf16.mxu0 %v2084_v42 }
 0x360   :  { %927 = vmatmul.mubr.bf16.gmra.mrb[56].mxu0 %v752_v60 }
 0x361   :  { %936 = vmatprep.mubr.bf16.mxu0 %v2084_v42 }
 0x368   :  { %937 = vmatmul.mubr.bf16.gmra.mrb[60].mxu0 %v753_v5 }
 0x369   :  { %1918 = vmatprep.mubr.bf16.mxu0 %v2209_v20 }
 0x403   :  { %v2399_v51 = vpop.f32.mrb[32].mxu0 }
 0x404   :  { %v870_v52 = vpop.f32.mrb[33].mxu0 }
 0x405   :  { %v2401_v31 = vpop.f32.mrb[34].mxu0 }
 0x406   :  { %v874_v6 = vpop.f32.mrb[35].mxu0 }
 0x407   :  { %v947_v38 = vpack.c.bf16 %v874_v6, %v870_v52 }
 0x409   :  { %1870 = vmatprep.subr.bf16.mxu1 %v947_v38 }
 0x40a   :  { %1871 = vmatpush3.bf16.msra.mxu1 %v947_v38 }
 0x40b   :  { %v2403_v56 = vpop.f32.mrb[36].mxu0 }
 0x40c   :  { %v880_v7 = vpop.f32.mrb[37].mxu0 }
 0x40d   :  { %v2405_v29 = vpop.f32.mrb[38].mxu0 }
 0x40e   :  { %v884_v35 = vpop.f32.mrb[39].mxu0 }
 0x40f   :  { %v948_v25 = vpack.c.bf16 %v884_v35, %v880_v7 }
 0x411   :  { %1872 = vmatprep.subr.bf16.mxu1 %v948_v25 }
 0x412   :  { %1873 = vmatpush3.bf16.msra.mxu1 %v948_v25 }
 0x413   :  { %v2407_v50 = vpop.f32.mrb[40].mxu0 }
 0x414   :  { %v890_v20 = vpop.f32.mrb[41].mxu0 }
 0x415   :  { %v2409_v61 = vpop.f32.mrb[42].mxu0 }
 0x416   :  { %v894_v59 = vpop.f32.mrb[43].mxu0 }
 0x417   :  { %v949_v8 = vpack.c.bf16 %v894_v59, %v890_v20 }
 0x419   :  { %1874 = vmatprep.subr.bf16.mxu1 %v949_v8 }
 0x41a   :  { %1875 = vmatpush3.bf16.msra.mxu1 %v949_v8 }
 0x41b   :  { %v2411_v45 = vpop.f32.mrb[44].mxu0 }
 0x41c   :  { %v900_v9 = vpop.f32.mrb[45].mxu0 }
 0x41d   :  { %v2413_v55 = vpop.f32.mrb[46].mxu0 }
 0x41e   :  { %v904_v11 = vpop.f32.mrb[47].mxu0 }
 0x41f   :  { %v950_v13 = vpack.c.bf16 %v904_v11, %v900_v9 }
 0x421   :  { %1876 = vmatprep.subr.bf16.mxu1 %v950_v13 }
 0x422   :  { %1877 = vmatpush3.bf16.msra.mxu1 %v950_v13 }
 0x423   :  { %v2415_v33 = vpop.f32.mrb[48].mxu0 }
 0x424   :  { %v910_v22 = vpop.f32.mrb[49].mxu0 }
 0x425   :  { %v2417_v12 = vpop.f32.mrb[50].mxu0 }
 0x426   :  { %v914_v10 = vpop.f32.mrb[51].mxu0 }
 0x427   :  { %v951_v54 = vpack.c.bf16 %v914_v10, %v910_v22 }
 0x429   :  { %1878 = vmatprep.subr.bf16.mxu1 %v951_v54 }
 0x42a   :  { %1879 = vmatpush3.bf16.msra.mxu1 %v951_v54 }
 0x42b   :  { %v2419_v16 = vpop.f32.mrb[52].mxu0 }
 0x42c   :  { %v920_v40 = vpop.f32.mrb[53].mxu0 }
 0x42d   :  { %v2421_v14 = vpop.f32.mrb[54].mxu0 }
 0x42e   :  { %v924_v15 = vpop.f32.mrb[55].mxu0 }
 0x42f   :  { %v952_v17 = vpack.c.bf16 %v924_v15, %v920_v40 }
 0x431   :  { %1880 = vmatprep.subr.bf16.mxu1 %v952_v17 }
 0x432   :  { %1881 = vmatpush3.bf16.msra.mxu1 %v952_v17 }
 0x433   :  { %v2423_v32 = vpop.f32.mrb[56].mxu0 }
 0x434   :  { %v930_v18 = vpop.f32.mrb[57].mxu0 }
 0x435   :  { %v2425_v39 = vpop.f32.mrb[58].mxu0 }
 0x436   :  { %v934_v23 = vpop.f32.mrb[59].mxu0 }
 0x437   :  { %v953_v47 = vpack.c.bf16 %v934_v23, %v930_v18 }
 0x439   :  { %1882 = vmatprep.subr.bf16.mxu1 %v953_v47 }
 0x43a   :  { %1883 = vmatpush3.bf16.msra.mxu1 %v953_v47 }
 0x43b   :  { %v2427_v19 = vpop.f32.mrb[60].mxu0 }
 0x43c   :  { %v940_v24 = vpop.f32.mrb[61].mxu0 }
 0x43d   :  { %v2429_v41 = vpop.f32.mrb[62].mxu0 }
 0x43e   :  { %v944_v27 = vpop.f32.mrb[63].mxu0 }
 0x43f   :  { %v954_v49 = vpack.c.bf16 %v944_v27, %v940_v24 }
 0x441   :  { %1884 = vmatprep.subr.bf16.mxu1 %v954_v49 }
 0x442   :  { %1885 = vmatpush3.bf16.msra.mxu1 %v954_v49 }
 0x443   :  { %1302 = vmatprep.subr.bf16.mxu1 %v1998_v30 }
 0x445   :  { %1887 = vmatmul.mubr.bf16.vlgmr.msra.gmra.mrb[32].mxu1 %v2248_v62  ;;  %v1999_v62 = vld [vmem:[#allocation2 + $0x110] ss:$8 sps:$4 sm:$0xff]  }
 0x446   :  { %1890 = vmatprep.mubr.bf16.mxu1 %v2253_v63  ;;  %1303 = vmatpush1.bf16.msra.mxu1 %v1996_v34  ;;  %v2004_v63 = vld [vmem:[#allocation2 + $0x124] ss:$8 sps:$4 sm:$0xff]  }
 0x447   :  { %1304 = vmatprep.subr.bf16.mxu1 %v2001_v37 }
 0x44a   :  { %1305 = vmatpush1.bf16.msra.mxu1 %v1999_v62 }
 0x44b   :  { %1306 = vmatprep.subr.bf16.mxu1 %v2004_v63 }
 0x44d   :  { %1891 = vmatmul.mubr.bf16.gmra.mrb[36].mxu1 %v2260_v0  ;;  %v2002_v0 = vld [vmem:[#allocation2 + $0x120] ss:$8 sps:$4 sm:$0xff]  }
 0x44e   :  { %1894 = vmatprep.mubr.bf16.mxu1 %v2265_v1  ;;  %1307 = vmatpush1.bf16.msra.mxu1 %v2002_v0  ;;  %v2007_v1 = vld [vmem:[#allocation2 + $0x134] ss:$8 sps:$4 sm:$0xff]  }
 0x44f   :  { %1308 = vmatprep.subr.bf16.mxu1 %v2007_v1 }
 0x455   :  { %1895 = vmatmul.mubr.bf16.gmra.mrb[40].mxu1 %v2272_v2  ;;  %v2005_v2 = vld [vmem:[#allocation2 + $0x130] ss:$8 sps:$4 sm:$0xff]  }
 0x456   :  { %1898 = vmatprep.mubr.bf16.mxu1 %v2277_v3  ;;  %1309 = vmatpush1.bf16.msra.mxu1 %v2005_v2  ;;  %v2010_v3 = vld [vmem:[#allocation2 + $0x144] ss:$8 sps:$4 sm:$0xff]  }
 0x457   :  { %1310 = vmatprep.subr.bf16.mxu1 %v2010_v3 }
 0x45d   :  { %1899 = vmatmul.mubr.bf16.gmra.mrb[44].mxu1 %v2284_v4  ;;  %v2008_v4 = vld [vmem:[#allocation2 + $0x140] ss:$8 sps:$4 sm:$0xff]  }
 0x45e   :  { %1334 = vmatprep.mubr.bf16.mxu1 %v2084_v42  ;;  %1311 = vmatpush1.bf16.msra.mxu1 %v2008_v4 }
 0x45f   :  { %1312 = vmatprep.subr.bf16.mxu1 %v2013_v21 }
 0x462   :  { %1313 = vmatpush1.bf16.msra.mxu1 %v2011_v26 }
 0x463   :  { %1314 = vmatprep.subr.bf16.mxu1 %v2016_v28 }
 0x466   :  { %1315 = vmatpush1.bf16.msra.mxu1 %v2014_v43 }
 0x467   :  { %1316 = vmatprep.subr.bf16.mxu1 %v2019_v46 }
 0x46a   :  { %1317 = vmatpush1.bf16.msra.mxu1 %v2017_v48 }
 0x518   :  { %v1888_v57 = vpop.f32.mrb[32].mxu1 }
 0x519   :  { %v2440_v58 = vadd.f32 %v1888_v57, %v2403_v56  ;;  %v989_v36 = vpop.f32.mrb[33].mxu1 }
 0x51a   :  { %v2443_v60 = vadd.f32 %v989_v36, %v2399_v51  ;;  %v1889_v5 = vpop.f32.mrb[34].mxu1 }
 0x51b   :  { %v2446_v52 = vadd.f32 %v1889_v5, %v2405_v29  ;;  %v992_v6 = vpop.f32.mrb[35].mxu1  ;;  %v1070_v51 = vmul.f32 %v2440_v58, %v2440_v58 }
 0x51c   :  { %v2449_v38 = vadd.f32 %v992_v6, %v2401_v31  ;;  %v1068_v7 = vmul.f32 %v2443_v60, %v2443_v60 }
 0x51d   :  { %v1071_v8 = vmul.f32 %v2446_v52, %v2446_v52 }
 0x51e   :  { %v1069_v35 = vmul.f32 %v2449_v38, %v2449_v38  ;;  %v1084_v56 = vadd.f32 %v2449_v38, %v2443_v60 }
 0x520   :  { %v1085_v25 = vadd.f32 %v1084_v56, %v2440_v58  ;;  %v1105_v29 = vadd.f32 %v1069_v35, %v1068_v7  ;;  %v1892_v20 = vpop.f32.mrb[36].mxu1 }
 0x521   :  { %v2461_v59 = vadd.f32 %v1892_v20, %v2411_v45  ;;  %v1005_v31 = vpop.f32.mrb[37].mxu1 }
 0x522   :  { %v1106_v9 = vadd.f32 %v1105_v29, %v1070_v51  ;;  %v2466_v11 = vadd.f32 %v1005_v31, %v2407_v50  ;;  %v1086_v13 = vadd.f32 %v1085_v25, %v2446_v52  ;;  %v1893_v22 = vpop.f32.mrb[38].mxu1 }
 0x523   :  { %v2470_v10 = vadd.f32 %v1893_v22, %v2413_v55  ;;  %v1008_v54 = vpop.f32.mrb[39].mxu1  ;;  %v1074_v55 = vmul.f32 %v2461_v59, %v2461_v59 }
 0x524   :  { %v1072_v40 = vmul.f32 %v2466_v11, %v2466_v11  ;;  %v1087_v45 = vadd.f32 %v1086_v13, %v2466_v11  ;;  %v1107_v15 = vadd.f32 %v1106_v9, %v1071_v8  ;;  %v2476_v17 = vadd.f32 %v1008_v54, %v2409_v61 }
 0x525   :  { %v1075_v61 = vmul.f32 %v2470_v10, %v2470_v10 }
 0x526   :  { %v1108_v18 = vadd.f32 %v1107_v15, %v1072_v40  ;;  %v1073_v50 = vmul.f32 %v2476_v17, %v2476_v17  ;;  %v1088_v23 = vadd.f32 %v1087_v45, %v2476_v17 }
 0x528   :  { %v1089_v47 = vadd.f32 %v1088_v23, %v2461_v59  ;;  %v1109_v24 = vadd.f32 %v1108_v18, %v1073_v50  ;;  %v1896_v27 = vpop.f32.mrb[40].mxu1 }
 0x529   :  { %v2485_v49 = vadd.f32 %v1896_v27, %v2419_v16  ;;  %v1021_v30 = vpop.f32.mrb[41].mxu1 }
 0x52a   :  { %v1110_v34 = vadd.f32 %v1109_v24, %v1074_v55  ;;  %v2490_v37 = vadd.f32 %v1021_v30, %v2415_v33  ;;  %v1090_v62 = vadd.f32 %v1089_v47, %v2470_v10  ;;  %v1897_v63 = vpop.f32.mrb[42].mxu1 }
 0x52b   :  { %v2494_v0 = vadd.f32 %v1897_v63, %v2421_v14  ;;  %v1024_v1 = vpop.f32.mrb[43].mxu1  ;;  %v1078_v14 = vmul.f32 %v2485_v49, %v2485_v49 }
 0x52c   :  { %v1076_v2 = vmul.f32 %v2490_v37, %v2490_v37  ;;  %v1091_v16 = vadd.f32 %v1090_v62, %v2490_v37  ;;  %v1111_v3 = vadd.f32 %v1110_v34, %v1075_v61  ;;  %v2500_v4 = vadd.f32 %v1024_v1, %v2417_v12 }
 0x52d   :  { %v1079_v12 = vmul.f32 %v2494_v0, %v2494_v0 }
 0x52e   :  { %v1112_v26 = vadd.f32 %v1111_v3, %v1076_v2  ;;  %v1077_v33 = vmul.f32 %v2500_v4, %v2500_v4  ;;  %v1092_v21 = vadd.f32 %v1091_v16, %v2500_v4  ;;  %v1729_v3 = vld [vmem:[%s2717_s5 + $0x2] sm:$0x3] }
 0x530   :  { %v1093_v28 = vadd.f32 %v1092_v21, %v2485_v49  ;;  %v1113_v43 = vadd.f32 %v1112_v26, %v1077_v33  ;;  %v1900_v46 = vpop.f32.mrb[44].mxu1 }
 0x531   :  { %v2509_v48 = vadd.f32 %v1900_v46, %v2427_v19  ;;  %v1037_v57 = vpop.f32.mrb[45].mxu1 }
 0x532   :  { %v1114_v36 = vadd.f32 %v1113_v43, %v1078_v14  ;;  %v1064_v5 = vadd.f32 %v1037_v57, %v2423_v32  ;;  %v1094_v6 = vadd.f32 %v1093_v28, %v2494_v0  ;;  %v1901_v7 = vpop.f32.mrb[46].mxu1 }
 0x533   :  { %v1067_v35 = vadd.f32 %v1901_v7, %v2429_v41  ;;  %v1040_v56 = vpop.f32.mrb[47].mxu1  ;;  %v1082_v9 = vmul.f32 %v2509_v48, %v2509_v48 }
 0x534   :  { %v1080_v51 = vmul.f32 %v1064_v5, %v1064_v5  ;;  %v1095_v25 = vadd.f32 %v1094_v6, %v1064_v5  ;;  %v1115_v29 = vadd.f32 %v1114_v36, %v1079_v12  ;;  %v1065_v20 = vadd.f32 %v1040_v56, %v2425_v39 }
 0x535   :  { %v1083_v22 = vmul.f32 %v1067_v35, %v1067_v35 }
 0x536   :  { %v1116_v19 = vadd.f32 %v1115_v29, %v1080_v51  ;;  %v1081_v31 = vmul.f32 %v1065_v20, %v1065_v20  ;;  %v1096_v8 = vadd.f32 %v1095_v25, %v1065_v20 }
 0x538   :  { %v1097_v13 = vadd.f32 %v1096_v8, %v2509_v48  ;;  %v1117_v32 = vadd.f32 %v1116_v19, %v1081_v31 }
 0x53a   :  { %v1098_v54 = vadd.f32 %v1097_v13, %v1067_v35  ;;  %v1118_v40 = vadd.f32 %v1117_v32, %v1082_v9 }
 0x53c   :  { %v1099_v45 = vrot.slane %v1098_v54, 4  ;;  %v1119_v41 = vadd.f32 %v1118_v40, %v1083_v22 }
 0x53e   :  { %v1100_v15 = vadd.f32 %v1099_v45, %v1098_v54  ;;  %v1120_v18 = vrot.slane %v1119_v41, 4 }
 0x540   :  { %v1101_v50 = vrot.slane %v1100_v15, 2  ;;  %v1121_v23 = vadd.f32 %v1120_v18, %v1119_v41 }
 0x542   :  { %v1102_v55 = vadd.f32 %v1101_v50, %v1100_v15  ;;  %v1122_v39 = vrot.slane %v1121_v23, 2 }
 0x544   :  { %v1103_v47 = vrot.slane %v1102_v55, 1  ;;  %v1123_v24 = vadd.f32 %v1122_v39, %v1121_v23 }
 0x546   :  { %v1104_v27 = vadd.f32 %v1103_v47, %v1102_v55  ;;  %v1124_v30 = vrot.slane %v1123_v24, 1 }
 0x548   :  { %v1125_v61 = vadd.f32 %v1124_v30, %v1123_v24  ;;  %v1126_v34 = vmul.f32 0.0078125, %v1104_v27 }
 0x54a   :  { %v1127_v62 = vmul.f32 0.0078125, %v1125_v61  ;;  %v1128_v63 = vmul.f32 %v1126_v34, %v1126_v34 }
 0x54c   :  { %v1129_v1 = vsub.f32 %v1127_v62, %v1128_v63 }
 0x54e   :  { %v1130_v2 = vmax.f32 %v1129_v1, 0.0 }
 0x550   :  { %v1131_v16 = vadd.f32 1e-05, %v1130_v2 }
 0x552   :  { %2022 = vrsqrt.f32 %v1131_v16 }
 0x55c   :  { %v2023_v26 = vpop.eup %2022 }
 0x55d   :  { %v1133_v33 = vmul.f32 %v2023_v26, %v1729_v3 }
 0x55f   :  { %v1134_v21 = vmul.f32 %v1133_v33, %v1126_v34  ;;  %v1142_v14 = vrot.slane %v1133_v33, %v2372_v44 }
 0x561   :  { %v1136_v28 = vrot.slane %v1134_v21, 7  ;;  %v1156_v43 = vmul.f32 %v1142_v14, %v1065_v20  ;;  %v1143_v46 = vmul.f32 %v1142_v14, %v2443_v60  ;;  %v1144_v57 = vmul.f32 %v1142_v14, %v2449_v38 }
 0x562   :  { %v1145_v12 = vmul.f32 %v1142_v14, %v2440_v58  ;;  %v1147_v36 = vmul.f32 %v1142_v14, %v2466_v11  ;;  %v1148_v6 = vmul.f32 %v1142_v14, %v2476_v17  ;;  %v1149_v56 = vmul.f32 %v1142_v14, %v2461_v59 }
 0x563   :  { %v1138_v7 = vsub.f32 %v1729_v3, %v1136_v28  ;;  %v1150_v51 = vmul.f32 %v1142_v14, %v2470_v10  ;;  %v1151_v25 = vmul.f32 %v1142_v14, %v2490_v37  ;;  %v1152_v29 = vmul.f32 %v1142_v14, %v2500_v4 }
 0x564   :  { %v1153_v20 = vmul.f32 %v1142_v14, %v2485_v49  ;;  %v1154_v60 = vmul.f32 %v1142_v14, %v2494_v0  ;;  %v1155_v38 = vmul.f32 %v1142_v14, %v1064_v5  ;;  %v1146_v11 = vmul.f32 %v1142_v14, %v2446_v52 }
 0x565   :  { %v1162_v58 = vrot.slane %v1138_v7, %v2375_v53  ;;  %v1157_v17 = vmul.f32 %v1142_v14, %v2509_v48  ;;  %v1158_v19 = vmul.f32 %v1142_v14, %v1067_v35 }
 0x567   :  { %v1163_v31 = vadd.f32 %v1162_v58, %v1143_v46  ;;  %v1164_v59 = vadd.f32 %v1162_v58, %v1144_v57  ;;  %v1165_v8 = vadd.f32 %v1162_v58, %v1145_v12  ;;  %v1166_v10 = vadd.f32 %v1162_v58, %v1146_v11 }
 0x568   :  { %v1167_v9 = vadd.f32 %v1162_v58, %v1147_v36  ;;  %v1168_v37 = vadd.f32 %v1162_v58, %v1148_v6  ;;  %v1169_v13 = vadd.f32 %v1162_v58, %v1149_v56  ;;  %v1170_v4 = vadd.f32 %v1162_v58, %v1150_v51 }
 0x569   :  { %v1179_v32 = vmax.f32 %v1163_v31, 0.0  ;;  %v1180_v49 = vmax.f32 %v1164_v59, 0.0  ;;  %v1181_v22 = vmax.f32 %v1165_v8, 0.0  ;;  %v1182_v0 = vmax.f32 %v1166_v10, 0.0 }
 0x56a   :  { %v1183_v5 = vmax.f32 %v1167_v9, 0.0  ;;  %v1184_v54 = vmax.f32 %v1168_v37, 0.0  ;;  %v1185_v40 = vmax.f32 %v1169_v13, 0.0  ;;  %v1186_v45 = vmax.f32 %v1170_v4, 0.0 }
 0x56b   :  { %v1214_v52 = vpack.c.bf16 %v1180_v49, %v1179_v32  ;;  %v1215_v41 = vpack.c.bf16 %v1182_v0, %v1181_v22  ;;  %v1171_v48 = vadd.f32 %v1162_v58, %v1151_v25  ;;  %v1172_v35 = vadd.f32 %v1162_v58, %v1152_v29 }
 0x56c   :  { %v1216_v15 = vpack.c.bf16 %v1184_v54, %v1183_v5  ;;  %v1217_v18 = vpack.c.bf16 %v1186_v45, %v1185_v40  ;;  %v1173_v50 = vadd.f32 %v1162_v58, %v1153_v20  ;;  %v1174_v23 = vadd.f32 %v1162_v58, %v1154_v60 }
 0x56d   :  { %1335 = vmatmul.mubr.bf16.vlgmr.msra.gmra.mrb[48].mxu1 %v1214_v52  ;;  %v1187_v55 = vmax.f32 %v1171_v48, 0.0  ;;  %v1188_v39 = vmax.f32 %v1172_v35, 0.0  ;;  %v1175_v47 = vadd.f32 %v1162_v58, %v1155_v38  ;;  %v1176_v24 = vadd.f32 %v1162_v58, %v1156_v43  ;;  %v2026_v48 = vld [vmem:[%s2713_s1 + $0x8] sm:$0xff]   ;;  %v2027_v35 = vld [vmem:[%s2713_s1 + $0x10] sm:$0xff]  }
 0x56e   :  { %1344 = vmatprep.mubr.bf16.mxu1 %v2084_v42  ;;  %v1189_v27 = vmax.f32 %v1173_v50, 0.0  ;;  %v1190_v30 = vmax.f32 %v1174_v23, 0.0  ;;  %v1177_v61 = vadd.f32 %v1162_v58, %v1157_v17  ;;  %v1178_v34 = vadd.f32 %v1162_v58, %v1158_v19  ;;  %v2030_v50 = vld [vmem:[%s2713_s1 + $0x28] sm:$0xff]   ;;  %v2031_v23 = vld [vmem:[%s2713_s1 + $0x30] sm:$0xff]  }
 0x56f   :  { %v1218_v62 = vpack.c.bf16 %v1188_v39, %v1187_v55  ;;  %v1191_v63 = vmax.f32 %v1175_v47, 0.0  ;;  %v1192_v1 = vmax.f32 %v1176_v24, 0.0  ;;  %v2032_v55 = vld [vmem:[%s2713_s1 + $0x38] sm:$0xff]  }
 0x570   :  { %v1219_v2 = vpack.c.bf16 %v1190_v30, %v1189_v27  ;;  %v1193_v16 = vmax.f32 %v1177_v61, 0.0  ;;  %v1194_v3 = vmax.f32 %v1178_v34, 0.0 }
 0x571   :  { %v1220_v26 = vpack.c.bf16 %v1192_v1, %v1191_v63 }
 0x572   :  { %v1221_v33 = vpack.c.bf16 %v1194_v3, %v1193_v16 }
 0x575   :  { %1345 = vmatmul.mubr.bf16.gmra.mrb[52].mxu1 %v1215_v41 }
 0x576   :  { %1354 = vmatprep.mubr.bf16.mxu1 %v2084_v42 }
 0x57d   :  { %1355 = vmatmul.mubr.bf16.gmra.mrb[56].mxu1 %v1216_v15  ;;  %v2028_v15 = vld [vmem:[%s2713_s1 + $0x18] sm:$0xff]  }
 0x57e   :  { %1364 = vmatprep.mubr.bf16.mxu1 %v2084_v42 }
 0x585   :  { %1365 = vmatmul.mubr.bf16.gmra.mrb[60].mxu1 %v1217_v18  ;;  %v2029_v18 = vld [vmem:[%s2713_s1 + $0x20] sm:$0xff]  }
 0x586   :  { %1374 = vmatprep.mubr.bf16.mxu1 %v2084_v42 }
 0x58d   :  { %1375 = vmatmul.mubr.bf16.gmra.mrb[64].mxu1 %v1218_v62 }
 0x58e   :  { %1384 = vmatprep.mubr.bf16.mxu1 %v2084_v42 }
 0x595   :  { %1385 = vmatmul.mubr.bf16.gmra.mrb[68].mxu1 %v1219_v2 }
 0x596   :  { %1394 = vmatprep.mubr.bf16.mxu1 %v2084_v42 }
 0x59d   :  { %1395 = vmatmul.mubr.bf16.gmra.mrb[72].mxu1 %v1220_v26 }
 0x59e   :  { %1404 = vmatprep.mubr.bf16.mxu1 %v2084_v42 }
 0x5a5   :  { %1405 = vmatmul.mubr.bf16.gmra.mrb[76].mxu1 %v1221_v33 }
 0x640   :  { %v2545_v21 = vpop.f32.mrb[48].mxu1 }
 0x641   :  { %v1338_v14 = vpop.f32.mrb[49].mxu1 }
 0x642   :  { %v2547_v28 = vpop.f32.mrb[50].mxu1 }
 0x643   :  { %v1342_v43 = vpop.f32.mrb[51].mxu1 }
 0x644   :  { %v1415_v46 = vpack.c.bf16 %v1342_v43, %v1338_v14 }
 0x646   :  { %1902 = vmatprep.subr.bf16.mxu0 %v1415_v46 }
 0x647   :  { %1903 = vmatpush3.bf16.msra.mxu0 %v1415_v46 }
 0x648   :  { %v2549_v57 = vpop.f32.mrb[52].mxu1 }
 0x649   :  { %v1348_v12 = vpop.f32.mrb[53].mxu1 }
 0x64a   :  { %v2551_v36 = vpop.f32.mrb[54].mxu1 }
 0x64b   :  { %v1352_v6 = vpop.f32.mrb[55].mxu1 }
 0x64c   :  { %v1416_v7 = vpack.c.bf16 %v1352_v6, %v1348_v12 }
 0x64e   :  { %1904 = vmatprep.subr.bf16.mxu0 %v1416_v7 }
 0x64f   :  { %1905 = vmatpush3.bf16.msra.mxu0 %v1416_v7 }
 0x650   :  { %v2553_v42 = vpop.f32.mrb[56].mxu1 }
 0x651   :  { %v1358_v56 = vpop.f32.mrb[57].mxu1 }
 0x652   :  { %v2555_v51 = vpop.f32.mrb[58].mxu1 }
 0x653   :  { %v1362_v25 = vpop.f32.mrb[59].mxu1 }
 0x654   :  { %v1417_v29 = vpack.c.bf16 %v1362_v25, %v1358_v56 }
 0x656   :  { %1906 = vmatprep.subr.bf16.mxu0 %v1417_v29 }
 0x657   :  { %1907 = vmatpush3.bf16.msra.mxu0 %v1417_v29 }
 0x658   :  { %v2557_v20 = vpop.f32.mrb[60].mxu1 }
 0x659   :  { %v1368_v60 = vpop.f32.mrb[61].mxu1 }
 0x65a   :  { %v2559_v38 = vpop.f32.mrb[62].mxu1 }
 0x65b   :  { %v1372_v58 = vpop.f32.mrb[63].mxu1 }
 0x65c   :  { %v1418_v11 = vpack.c.bf16 %v1372_v58, %v1368_v60 }
 0x65e   :  { %1908 = vmatprep.subr.bf16.mxu0 %v1418_v11 }
 0x65f   :  { %1909 = vmatpush3.bf16.msra.mxu0 %v1418_v11 }
 0x660   :  { %v2561_v17 = vpop.f32.mrb[64].mxu1 }
 0x661   :  { %v1378_v19 = vpop.f32.mrb[65].mxu1 }
 0x662   :  { %v2563_v31 = vpop.f32.mrb[66].mxu1 }
 0x663   :  { %v1382_v59 = vpop.f32.mrb[67].mxu1 }
 0x664   :  { %v1419_v8 = vpack.c.bf16 %v1382_v59, %v1378_v19 }
 0x666   :  { %1910 = vmatprep.subr.bf16.mxu0 %v1419_v8 }
 0x667   :  { %1911 = vmatpush3.bf16.msra.mxu0 %v1419_v8 }
 0x668   :  { %v2565_v10 = vpop.f32.mrb[68].mxu1 }
 0x669   :  { %v1388_v9 = vpop.f32.mrb[69].mxu1 }
 0x66a   :  { %v2567_v37 = vpop.f32.mrb[70].mxu1 }
 0x66b   :  { %v1392_v13 = vpop.f32.mrb[71].mxu1 }
 0x66c   :  { %v1420_v4 = vpack.c.bf16 %v1392_v13, %v1388_v9 }
 0x66e   :  { %1912 = vmatprep.subr.bf16.mxu0 %v1420_v4 }
 0x66f   :  { %1913 = vmatpush3.bf16.msra.mxu0 %v1420_v4 }
 0x670   :  { %v2569_v32 = vpop.f32.mrb[72].mxu1 }
 0x671   :  { %v1398_v49 = vpop.f32.mrb[73].mxu1 }
 0x672   :  { %v2571_v22 = vpop.f32.mrb[74].mxu1 }
 0x673   :  { %v1402_v0 = vpop.f32.mrb[75].mxu1 }
 0x674   :  { %v1421_v5 = vpack.c.bf16 %v1402_v0, %v1398_v49 }
 0x676   :  { %1914 = vmatprep.subr.bf16.mxu0 %v1421_v5 }
 0x677   :  { %1915 = vmatpush3.bf16.msra.mxu0 %v1421_v5 }
 0x678   :  { %v2573_v54 = vpop.f32.mrb[76].mxu1 }
 0x679   :  { %v1408_v40 = vpop.f32.mrb[77].mxu1 }
 0x67a   :  { %v2575_v45 = vpop.f32.mrb[78].mxu1 }
 0x67b   :  { %v1412_v52 = vpop.f32.mrb[79].mxu1 }
 0x67c   :  { %v1422_v41 = vpack.c.bf16 %v1412_v52, %v1408_v40 }
 0x67e   :  { %1916 = vmatprep.subr.bf16.mxu0 %v1422_v41 }
 0x67f   :  { %1917 = vmatpush3.bf16.msra.mxu0 %v1422_v41 }
 0x682   :  { %1919 = vmatmul.mubr.bf16.vlgmr.msra.gmra.mrb[64].mxu0 %v2026_v48 }
 0x683   :  { %1922 = vmatprep.mubr.bf16.mxu0 %v2027_v35 }
 0x68a   :  { %1923 = vmatmul.mubr.bf16.gmra.mrb[68].mxu0 %v2028_v15 }
 0x68b   :  { %1926 = vmatprep.mubr.bf16.mxu0 %v2029_v18 }
 0x692   :  { %1927 = vmatmul.mubr.bf16.gmra.mrb[72].mxu0 %v2030_v50 }
 0x693   :  { %1930 = vmatprep.mubr.bf16.mxu0 %v2031_v23 }
 0x69a   :  { %1931 = vmatmul.mubr.bf16.gmra.mrb[76].mxu0 %v2032_v55 }
 0x755   :  { %v1920_v39 = vpop.f32.mrb[64].mxu0 }
 0x756   :  { %v2599_v47 = vadd.f32 %v1920_v39, %v2549_v57  ;;  %v1457_v24 = vpop.f32.mrb[65].mxu0 }
 0x757   :  { %v2602_v27 = vadd.f32 %v1457_v24, %v2545_v21  ;;  %v1921_v30 = vpop.f32.mrb[66].mxu0 }
 0x758   :  { %v2605_v61 = vadd.f32 %v1921_v30, %v2551_v36  ;;  %v1460_v34 = vpop.f32.mrb[67].mxu0  ;;  %v1538_v16 = vmul.f32 %v2599_v47, %v2599_v47 }
 0x759   :  { %v2608_v62 = vadd.f32 %v1460_v34, %v2547_v28  ;;  %v1536_v63 = vmul.f32 %v2602_v27, %v2602_v27 }
 0x75a   :  { %v1539_v28 = vmul.f32 %v2605_v61, %v2605_v61 }
 0x75b   :  { %v1537_v1 = vmul.f32 %v2608_v62, %v2608_v62  ;;  %v1552_v2 = vadd.f32 %v2608_v62, %v2602_v27 }
 0x75d   :  { %v1553_v3 = vadd.f32 %v1552_v2, %v2599_v47  ;;  %v1573_v26 = vadd.f32 %v1537_v1, %v1536_v63  ;;  %v1924_v33 = vpop.f32.mrb[68].mxu0 }
 0x75e   :  { %v2620_v21 = vadd.f32 %v1924_v33, %v2557_v20  ;;  %v1473_v14 = vpop.f32.mrb[69].mxu0 }
 0x75f   :  { %v1574_v43 = vadd.f32 %v1573_v26, %v1538_v16  ;;  %v2625_v46 = vadd.f32 %v1473_v14, %v2553_v42  ;;  %v1554_v57 = vadd.f32 %v1553_v3, %v2605_v61  ;;  %v1925_v12 = vpop.f32.mrb[70].mxu0 }
 0x760   :  { %v2629_v36 = vadd.f32 %v1925_v12, %v2559_v38  ;;  %v1476_v6 = vpop.f32.mrb[71].mxu0  ;;  %v1542_v38 = vmul.f32 %v2620_v21, %v2620_v21 }
 0x761   :  { %v1540_v7 = vmul.f32 %v2625_v46, %v2625_v46  ;;  %v1555_v56 = vadd.f32 %v1554_v57, %v2625_v46  ;;  %v1575_v25 = vadd.f32 %v1574_v43, %v1539_v28  ;;  %v2635_v29 = vadd.f32 %v1476_v6, %v2555_v51 }
 0x762   :  { %v1543_v51 = vmul.f32 %v2629_v36, %v2629_v36 }
 0x763   :  { %v1576_v20 = vadd.f32 %v1575_v25, %v1540_v7  ;;  %v1541_v42 = vmul.f32 %v2635_v29, %v2635_v29  ;;  %v1556_v60 = vadd.f32 %v1555_v56, %v2635_v29 }
 0x765   :  { %v1557_v58 = vadd.f32 %v1556_v60, %v2620_v21  ;;  %v1577_v11 = vadd.f32 %v1576_v20, %v1541_v42  ;;  %v1928_v19 = vpop.f32.mrb[72].mxu0 }
 0x766   :  { %v2644_v59 = vadd.f32 %v1928_v19, %v2565_v10  ;;  %v1489_v8 = vpop.f32.mrb[73].mxu0 }
 0x767   :  { %v1578_v9 = vadd.f32 %v1577_v11, %v1542_v38  ;;  %v2649_v13 = vadd.f32 %v1489_v8, %v2561_v17  ;;  %v1558_v4 = vadd.f32 %v1557_v58, %v2629_v36  ;;  %v1929_v49 = vpop.f32.mrb[74].mxu0 }
 0x768   :  { %v2653_v0 = vadd.f32 %v1929_v49, %v2567_v37  ;;  %v1492_v5 = vpop.f32.mrb[75].mxu0  ;;  %v1546_v37 = vmul.f32 %v2644_v59, %v2644_v59 }
 0x769   :  { %v1544_v40 = vmul.f32 %v2649_v13, %v2649_v13  ;;  %v1559_v10 = vadd.f32 %v1558_v4, %v2649_v13  ;;  %v1579_v52 = vadd.f32 %v1578_v9, %v1543_v51  ;;  %v2659_v41 = vadd.f32 %v1492_v5, %v2563_v31 }
 0x76a   :  { %v1547_v31 = vmul.f32 %v2653_v0, %v2653_v0 }
 0x76b   :  { %v1580_v48 = vadd.f32 %v1579_v52, %v1544_v40  ;;  %v1545_v17 = vmul.f32 %v2659_v41, %v2659_v41  ;;  %v1560_v35 = vadd.f32 %v1559_v10, %v2659_v41  ;;  %v1746_v10 = vld [vmem:[%s2717_s5 + $0x4] sm:$0x3]  ;;  %s2085_s5 = smov [#allocation5]  }
 0x76c   :  { %s1684_s28 = sshll.u32 %s2085_s5, 4  ;;  %s1685_s28 = int_to_ptr.vmem [resolvable:$true] %s1684_s28 }
 0x76d   :  { %v1561_v15 = vadd.f32 %v1560_v35, %v2644_v59  ;;  %v1581_v18 = vadd.f32 %v1580_v48, %v1545_v17  ;;  %v1932_v50 = vpop.f32.mrb[76].mxu0  ;;  %s2055_s29 = scalar_lea.vmem %s1685_s28, 2048  ;;  %p2060_p9 = scmp.lt.s32.totalorder %s1685_s28, %s1685_s28 }
 0x76e   :  { %v2668_v23 = vadd.f32 %v1932_v50, %v2573_v54  ;;  %v1505_v55 = vpop.f32.mrb[77].mxu0  ;;  %p2056_p8 = scmp.ne.s32.totalorder %s1685_s28, %s2055_s29  ;;  %p2061_p10 = scmp.lt.s32.totalorder %s2055_s29, %s2055_s29 }
 0x76f   :  { %v1582_v39 = vadd.f32 %v1581_v18, %v1546_v37  ;;  %v1532_v24 = vadd.f32 %v1505_v55, %v2569_v32  ;;  %v1562_v30 = vadd.f32 %v1561_v15, %v2653_v0  ;;  %v1933_v34 = vpop.f32.mrb[78].mxu0 }
 0x770   :  { %v1535_v63 = vadd.f32 %v1933_v34, %v2575_v45  ;;  %v1508_v1 = vpop.f32.mrb[79].mxu0  ;;  %v1550_v28 = vmul.f32 %v2668_v23, %v2668_v23  ;;  %p2062_p11 = por %p2061_p10, %p2060_p9 }
 0x771   :  { %v1548_v2 = vmul.f32 %v1532_v24, %v1532_v24  ;;  %v1563_v16 = vadd.f32 %v1562_v30, %v1532_v24  ;;  %v1583_v3 = vadd.f32 %v1582_v39, %v1547_v31  ;;  %v1533_v26 = vadd.f32 %v1508_v1, %v2571_v22 }
 0x772   :  { %v1551_v57 = vmul.f32 %v1535_v63, %v1535_v63  ;;  %p2063_p12 = pnand %p2062_p11, %p2056_p8 }
 0x773   :  { %v1584_v54 = vadd.f32 %v1583_v3, %v1548_v2  ;;  %v1549_v33 = vmul.f32 %v1533_v26, %v1533_v26  ;;  %v1564_v14 = vadd.f32 %v1563_v16, %v1533_v26 }
 0x775   :  { %v1565_v43 = vadd.f32 %v1564_v14, %v2668_v23  ;;  %v1585_v32 = vadd.f32 %v1584_v54, %v1549_v33 }
 0x777   :  { %v1566_v12 = vadd.f32 %v1565_v43, %v1535_v63  ;;  %v1586_v6 = vadd.f32 %v1585_v32, %v1550_v28 }
 0x779   :  { %v1567_v7 = vrot.slane %v1566_v12, 4  ;;  %v1587_v45 = vadd.f32 %v1586_v6, %v1551_v57 }
 0x77b   :  { %v1568_v56 = vadd.f32 %v1567_v7, %v1566_v12  ;;  %v1588_v25 = vrot.slane %v1587_v45, 4 }
 0x77d   :  { %v1569_v20 = vrot.slane %v1568_v56, 2  ;;  %v1589_v42 = vadd.f32 %v1588_v25, %v1587_v45 }
 0x77f   :  { %v1570_v60 = vadd.f32 %v1569_v20, %v1568_v56  ;;  %v1590_v22 = vrot.slane %v1589_v42, 2 }
 0x781   :  { %v1571_v38 = vrot.slane %v1570_v60, 1  ;;  %v1591_v58 = vadd.f32 %v1590_v22, %v1589_v42 }
 0x783   :  { %v1572_v11 = vadd.f32 %v1571_v38, %v1570_v60  ;;  %v1592_v19 = vrot.slane %v1591_v58, 1 }
 0x785   :  { %v1593_v8 = vadd.f32 %v1592_v19, %v1591_v58  ;;  %v1594_v51 = vmul.f32 0.0078125, %v1572_v11 }
 0x787   :  { %v1595_v9 = vmul.f32 0.0078125, %v1593_v8  ;;  %v1596_v4 = vmul.f32 %v1594_v51, %v1594_v51 }
 0x789   :  { %v1597_v49 = vsub.f32 %v1595_v9, %v1596_v4 }
 0x78b   :  { %v1598_v5 = vmax.f32 %v1597_v49, 0.0 }
 0x78d   :  { %v1599_v40 = vadd.f32 1e-05, %v1598_v5 }
 0x78f   :  { %2024 = vrsqrt.f32 %v1599_v40 }
 0x799   :  { %v2025_v52 = vpop.eup %2024 }
 0x79a   :  { %v1601_v48 = vmul.f32 %v2025_v52, %v1746_v10 }
 0x79c   :  { %v1602_v17 = vmul.f32 %v1601_v48, %v1594_v51  ;;  %v1610_v35 = vrot.slane %v1601_v48, %v2372_v44 }
 0x79e   :  { %v1604_v37 = vrot.slane %v1602_v17, 7  ;;  %v1624_v15 = vmul.f32 %v1610_v35, %v1533_v26  ;;  %v1611_v18 = vmul.f32 %v1610_v35, %v2602_v27  ;;  %v1612_v50 = vmul.f32 %v1610_v35, %v2608_v62 }
 0x79f   :  { %v1615_v55 = vmul.f32 %v1610_v35, %v2625_v46  ;;  %v1616_v31 = vmul.f32 %v1610_v35, %v2635_v29  ;;  %v1617_v30 = vmul.f32 %v1610_v35, %v2620_v21  ;;  %v1618_v34 = vmul.f32 %v1610_v35, %v2629_v36 }
 0x7a0   :  { %v1606_v39 = vsub.f32 %v1746_v10, %v1604_v37  ;;  %v1619_v1 = vmul.f32 %v1610_v35, %v2649_v13  ;;  %v1620_v2 = vmul.f32 %v1610_v35, %v2659_v41  ;;  %v1621_v44 = vmul.f32 %v1610_v35, %v2644_v59 }
 0x7a1   :  { %v1622_v16 = vmul.f32 %v1610_v35, %v2653_v0  ;;  %v1623_v27 = vmul.f32 %v1610_v35, %v1532_v24  ;;  %v1613_v46 = vmul.f32 %v1610_v35, %v2599_v47  ;;  %v1625_v29 = vmul.f32 %v1610_v35, %v2668_v23 }
 0x7a2   :  { %v1630_v62 = vrot.slane %v1606_v39, %v2375_v53  ;;  %v1626_v3 = vmul.f32 %v1610_v35, %v1535_v63  ;;  %v1614_v21 = vmul.f32 %v1610_v35, %v2605_v61 }
 0x7a4   :  { %v1644_v26 = vadd.f32 %v1630_v62, %v1624_v15  ;;  %v1631_v36 = vadd.f32 %v1630_v62, %v1611_v18  ;;  %v1632_v54 = vadd.f32 %v1630_v62, %v1612_v50  ;;  %v1633_v13 = vadd.f32 %v1630_v62, %v1613_v46 }
 0x7a5   :  { %v1634_v33 = vadd.f32 %v1630_v62, %v1614_v21  ;;  %v1635_v41 = vadd.f32 %v1630_v62, %v1615_v55  ;;  %v1636_v14 = vadd.f32 %v1630_v62, %v1616_v31  ;;  %v1637_v59 = vadd.f32 %v1630_v62, %v1617_v30 }
 0x7a6   :  { %v1660_v28 = vmax.f32 %v1644_v26, 0.0  ;;  %v1638_v0 = vadd.f32 %v1630_v62, %v1618_v34  ;;  %v1639_v24 = vadd.f32 %v1630_v62, %v1619_v1  ;;  %v1640_v43 = vadd.f32 %v1630_v62, %v1620_v2 }
 0x7a7   :  { %v1641_v53 = vadd.f32 %v1630_v62, %v1621_v44  ;;  %v1642_v32 = vadd.f32 %v1630_v62, %v1622_v16  ;;  %v1643_v47 = vadd.f32 %v1630_v62, %v1623_v27  ;;  %v1645_v57 = vadd.f32 %v1630_v62, %v1625_v29 }
 0x7a8   :  { %1676 = vst [vmem:[#allocation5 + $0x68] sm:$0xff] %v1660_v28  ;;  %v1646_v23 = vadd.f32 %v1630_v62, %v1626_v3  ;;  %v1647_v63 = vmax.f32 %v1631_v36, 0.0  ;;  %v1648_v61 = vmax.f32 %v1632_v54, 0.0  ;;  %v1649_v12 = vmax.f32 %v1633_v13, 0.0 }
 0x7a9   :  { %v1650_v6 = vmax.f32 %v1634_v33, 0.0  ;;  %v1651_v7 = vmax.f32 %v1635_v41, 0.0  ;;  %v1652_v45 = vmax.f32 %v1636_v14, 0.0  ;;  %v1653_v56 = vmax.f32 %v1637_v59, 0.0 }
 0x7aa   :  { %v1654_v25 = vmax.f32 %v1638_v0, 0.0  ;;  %v1655_v20 = vmax.f32 %v1639_v24, 0.0  ;;  %v1656_v42 = vmax.f32 %v1640_v43, 0.0  ;;  %v1657_v60 = vmax.f32 %v1641_v53, 0.0  ;;  %1663 = vst [vmem:[#allocation5] sm:$0xff] %v1647_v63  ;;  %1664 = vst [vmem:[#allocation5 + $0x8] sm:$0xff] %v1648_v61 }
 0x7ab   :  { %1665 = vst [vmem:[#allocation5 + $0x10] sm:$0xff] %v1649_v12  ;;  %v1658_v22 = vmax.f32 %v1642_v32, 0.0  ;;  %v1659_v38 = vmax.f32 %v1643_v47, 0.0  ;;  %v1661_v58 = vmax.f32 %v1645_v57, 0.0  ;;  %v1662_v11 = vmax.f32 %v1646_v23, 0.0  ;;  %1666 = vst [vmem:[#allocation5 + $0x18] sm:$0xff] %v1650_v6 }
 0x7ac   :  { %1667 = vst [vmem:[#allocation5 + $0x20] sm:$0xff] %v1651_v7  ;;  %1668 = vst [vmem:[#allocation5 + $0x28] sm:$0xff] %v1652_v45 }
 0x7ad   :  { %1669 = vst [vmem:[#allocation5 + $0x30] sm:$0xff] %v1653_v56  ;;  %1670 = vst [vmem:[#allocation5 + $0x38] sm:$0xff] %v1654_v25 }
 0x7ae   :  { %1671 = vst [vmem:[#allocation5 + $0x40] sm:$0xff] %v1655_v20  ;;  %1672 = vst [vmem:[#allocation5 + $0x48] sm:$0xff] %v1656_v42 }
 0x7af   :  { %1673 = vst [vmem:[#allocation5 + $0x50] sm:$0xff] %v1657_v60  ;;  %1674 = vst [vmem:[#allocation5 + $0x58] sm:$0xff] %v1658_v22 }
 0x7b0   :  { %1675 = vst [vmem:[#allocation5 + $0x60] sm:$0xff] %v1659_v38  ;;  %1677 = vst [vmem:[#allocation5 + $0x70] sm:$0xff] %v1661_v58 }
 0x7b1   :  { %1678 = vst [vmem:[#allocation5 + $0x78] sm:$0xff] %v1662_v11 }
 0x7b2   :  { %2066 = shalt.err (!%p2063_p12)
}
 0x7b3   :  { %s2067_s10 = scalar_lea.hbm %s2718_s6, 2048 }
 0x7b4   :  { %p2068_p13 = scmp.ne.s32.totalorder %s2718_s6, %s2067_s10  ;;  %p2071_p0 = scmp.lt.u32.totalorder %s2067_s10, %s2718_s6 }
 0x7b6   :  { %p2073_p1 = pnand %p2071_p0, %p2068_p13 }
 0x7b8   :  { %2076 = shalt.err (!%p2073_p1)
}
 0x7b9   :  { %1690 = dma.vmem_to_hbm [thread:$0]  %s1685_s28, 2048, %s2718_s6, [#allocation4], %s2082_s7, %s2082_s7, %s2083_s8  }
 0x7ba   :  { %2079 = dma.done.wait [#allocation4], 2048  }
 0x7bb   :  { %2080 = vsyncadd [#allocation4], 4294965248 }
 0x7bc   :  { %1694 = vsyncpa [#allocation3], 1 }
 0x7bd   :  { %1695 = vsyncpa [#allocation4], 1 }

</bundles_post_ra>
